<compile_context>
chip_gen: v7x
topology: tpu7x:2x2x1
jax: 0.10.0
libtpu: 0.0.40
codegen_flags: <defaults>
</compile_context>

<pallas_src>
import math
import functools

import jax
import jax.numpy as jnp
from jax.experimental import pallas as pl
from jax.experimental.pallas import tpu as pltpu

LN_EPS = 1e-5  # PyTorch nn.LayerNorm default


def _layer_norm(v, g, b):
    # f32 throughout — only the big matmul inputs are bf16.
    mu = jnp.mean(v, axis=-1, keepdims=True)
    var = jnp.mean((v - mu) ** 2, axis=-1, keepdims=True)
    return (v - mu) * jax.lax.rsqrt(var + LN_EPS) * g + b


def transformer_block_kernel(heads, seq_len,
                             x_ref,
                             ln1g_ref, ln1b_ref,
                             wq_ref, wk_ref, wv_ref,
                             bq_ref, bk_ref, bv_ref,
                             wo_ref, bo_ref,
                             ln2g_ref, ln2b_ref,
                             w1_ref, b1_ref, w2_ref, b2_ref,
                             o_ref):
    R, D = x_ref.shape          # R = batch_block * seq_len rows in this block
    S = seq_len
    bb = R // S                 # whole batch elements in this block
    hd = D // heads
    scale = 1.0 / math.sqrt(hd)

    x = x_ref[...]                                           # (R, D) f32

    # ---------------- self-attention branch ----------------
    xn = _layer_norm(x, ln1g_ref[...], ln1b_ref[...])        # (R, D) f32
    xnb = xn.astype(wq_ref.dtype)                            # single bf16 cast

    # Three separate projections (lane-aligned outputs, shared bf16 input).
    q = jnp.dot(xnb, wq_ref[...], preferred_element_type=jnp.float32) + bq_ref[...]
    k = jnp.dot(xnb, wk_ref[...], preferred_element_type=jnp.float32) + bk_ref[...]
    v = jnp.dot(xnb, wv_ref[...], preferred_element_type=jnp.float32) + bv_ref[...]

    # Fold 1/sqrt(hd) into q (R*D elems) rather than into the (S,S) scores.
    # Reshapes below only split the leading (row) dim; lane dim D is untouched,
    # so they are layout preserving.
    q = (q * scale).reshape(bb, S, D)
    k = k.reshape(bb, S, D)
    v = v.reshape(bb, S, D)

    # Per-head attention with the out-projection folded into the loop:
    #   x1 = x + sum_h softmax(q_h k_h^T) v_h @ Wo[h*hd:(h+1)*hd, :] + bo
    # Each head's contribution is a full-width (R, D) matmul result that is
    # accumulated in f32 vregs — no lane-sub-slice stores, no scratch, no
    # concat.  MXU has huge slack here so the extra tiny matmuls are free.
    acc = x                                                  # residual, f32
    for h in range(heads):                                   # static unroll
        sl = slice(h * hd, (h + 1) * hd)
        qh = q[:, :, sl]                                     # (bb, S, hd)
        kh = k[:, :, sl]
        vh = v[:, :, sl]
        s = jnp.einsum('bqd,bkd->bqk', qh, kh,
                       preferred_element_type=jnp.float32)   # (bb, S, S)
        s = s - jnp.max(s, axis=-1, keepdims=True)
        e = jnp.exp(s)
        # EUP approximate reciprocal instead of a VALU divide.
        p = e * pl.reciprocal(jnp.sum(e, axis=-1, keepdims=True), approx=True)
        oh = jnp.einsum('bqk,bkd->bqd', p, vh,
                        preferred_element_type=jnp.float32)  # (bb, S, hd)
        # Out-projection slice for this head: clean leading-index load.
        acc = acc + jnp.dot(oh.reshape(R, hd).astype(wo_ref.dtype), wo_ref[h],
                            preferred_element_type=jnp.float32)
    x1 = acc + bo_ref[...]                                   # (R, D) f32

    # ---------------- FFN branch ----------------
    xn2 = _layer_norm(x1, ln2g_ref[...], ln2b_ref[...])
    h1 = jnp.dot(xn2.astype(w1_ref.dtype), w1_ref[...],
                 preferred_element_type=jnp.float32) + b1_ref[...]       # (R, 4D)
    # exact (erf-based) GELU — PyTorch nn.GELU() default.
    # (jax.nn.gelu(approximate=True) would offload to the EUP but deviates
    # from the PyTorch module's exact semantics, so it is not used.)
    g = 0.5 * h1 * (1.0 + jax.lax.erf(h1 * (1.0 / math.sqrt(2.0))))
    h2 = jnp.dot(g.astype(w2_ref.dtype), w2_ref[...],
                 preferred_element_type=jnp.float32) + b2_ref[...]       # (R, D)

    # At D=32 this is a masked (32-lane) store; acceptable at this size.  At
    # production D, keep D a multiple of 128 for an unmasked lane-dense vst.
    o_ref[...] = (x1 + h2).astype(o_ref.dtype)


def transformer_block(x, params, heads, batch_block=None):
    """x: (B, S, D) f32.

    params: (ln1g, ln1b, wqkv (D,3D), bqkv (1,3D), wo (D,D), bo (1,D),
             ln2g, ln2b, w1 (D,4D), b1 (1,4D), w2 (4D,D), b2 (1,D)) —
    weights pre-transposed to (in, out); big matmul weights may be bf16,
    LN params / biases f32.

    batch_block: batch elements per grid step.  Default None = all of them
    (single grid step).  Only split (e.g. B//2 to feed both v7x TensorCores)
    when each step still gets >=256 rows; at toy sizes splitting is pure
    per-step overhead (~0.35 us/step)."""
    (ln1g, ln1b, wqkv, bqkv, wo, bo, ln2g, ln2b, w1, b1, w2, b2) = params
    B, S, D = x.shape
    assert D % heads == 0
    hd = D // heads
    bb = B if batch_block is None else batch_block
    assert B % bb == 0
    R = bb * S                     # rows per grid step
    nsteps = B // bb

    # Fold batch into the matmul row dimension outside the kernel (free reshape).
    x2 = x.reshape(B * S, D)

    # Split the packed QKV projection so q/k/v land lane-aligned at offset 0
    # in-kernel; group the out-projection rows per head.  These are free,
    # one-off XLA ops in the wrapper.
    wq, wk, wv = wqkv[:, :D], wqkv[:, D:2 * D], wqkv[:, 2 * D:]
    bq, bk, bv = bqkv[:, :D], bqkv[:, D:2 * D], bqkv[:, 2 * D:]
    wo_h = wo.reshape(heads, hd, D)

    def weight_spec(shape):
        # Constant index_map across the grid: the block is the same every step.
        if nsteps > 1:
            # Don't double-buffer constant weights (halves resident weight VMEM).
            return pl.BlockSpec(shape, lambda i: (0,) * len(shape),
                                pipeline_mode=pl.Buffered(1))
        return pl.BlockSpec(shape, lambda i: (0,) * len(shape))

    in_specs = [
        pl.BlockSpec((R, D), lambda i: (i, 0)),            # x rows
        weight_spec((1, D)), weight_spec((1, D)),          # ln1 gamma / beta
        weight_spec((D, D)), weight_spec((D, D)), weight_spec((D, D)),  # Wq Wk Wv
        weight_spec((1, D)), weight_spec((1, D)), weight_spec((1, D)),  # bq bk bv
        weight_spec((heads, hd, D)), weight_spec((1, D)),  # Wo (per-head), bo
        weight_spec((1, D)), weight_spec((1, D)),          # ln2 gamma / beta
        weight_spec((D, 4 * D)), weight_spec((1, 4 * D)),  # ffn W1, b1
        weight_spec((4 * D, D)), weight_spec((1, D)),      # ffn W2, b2
    ]

    out = pl.pallas_call(
        functools.partial(transformer_block_kernel, heads, S),
        out_shape=jax.ShapeDtypeStruct((B * S, D), x.dtype),
        grid_spec=pltpu.PrefetchScalarGridSpec(
            num_scalar_prefetch=0,
            grid=(nsteps,),
            in_specs=in_specs,
            out_specs=pl.BlockSpec((R, D), lambda i: (i, 0)),
        ),
        compiler_params=pltpu.CompilerParams(
            dimension_semantics=("parallel",),
            # Actual footprint is well under 1 MiB; 8 MiB leaves generous
            # headroom for compiler scratch while staying far below the
            # 64 MiB physical VMEM of a v7x TensorCore.
            vmem_limit_bytes=8 * 1024 * 1024,
        ),
    )(x2, ln1g, ln1b, wq, wk, wv, bq, bk, bv, wo_h, bo,
      ln2g, ln2b, w1, b1, w2, b2)
    return out.reshape(B, S, D)


def transformer_block_reference(x, params, heads):
    """Pure-JAX f32 reference replicating PyTorch semantics (for verification)."""
    (ln1g, ln1b, wqkv, bqkv, wo, bo, ln2g, ln2b, w1, b1, w2, b2) = params
    B, S, D = x.shape
    hd = D // heads

    def ln(v, g, b):
        mu = v.mean(-1, keepdims=True)
        var = ((v - mu) ** 2).mean(-1, keepdims=True)
        return (v - mu) / jnp.sqrt(var + LN_EPS) * g + b

    xn = ln(x, ln1g, ln1b)
    qkv = xn @ wqkv + bqkv
    q, k, v = jnp.split(qkv, 3, axis=-1)
    q = q.reshape(B, S, heads, hd).transpose(0, 2, 1, 3)
    k = k.reshape(B, S, heads, hd).transpose(0, 2, 1, 3)
    v = v.reshape(B, S, heads, hd).transpose(0, 2, 1, 3)
    s = (q @ k.transpose(0, 1, 3, 2)) / math.sqrt(hd)
    p = jax.nn.softmax(s, axis=-1)
    o = (p @ v).transpose(0, 2, 1, 3).reshape(B, S, D)
    attn = o @ wo + bo
    x1 = x + attn
    xn2 = ln(x1, ln2g, ln2b)
    h = xn2 @ w1 + b1
    g = 0.5 * h * (1.0 + jax.scipy.special.erf(h / math.sqrt(2.0)))
    return x1 + g @ w2 + b2


if __name__ == "__main__":
    B, S, D, H = 2, 8, 32, 8     # dim=32, heads=8 -> head_dim=4

    key = jax.random.PRNGKey(0)
    keys = jax.random.split(key, 13)

    def rnd(k, shape, s=0.05):
        return (s * jax.random.normal(k, shape)).astype(jnp.float32)

    # Parameters in PyTorch conventions (Linear weight = (out, in)), then
    # pre-transposed so the kernel computes x @ W without any in-kernel .T.
    ln1g = (1.0 + rnd(keys[0], (1, D), 0.1)).astype(jnp.float32)
    ln1b = rnd(keys[1], (1, D), 0.1)
    in_proj_w = rnd(keys[2], (3 * D, D))          # packed [Wq; Wk; Wv]
    in_proj_b = rnd(keys[3], (1, 3 * D), 0.02)
    out_proj_w = rnd(keys[4], (D, D))
    out_proj_b = rnd(keys[5], (1, D), 0.02)
    ln2g = (1.0 + rnd(keys[6], (1, D), 0.1)).astype(jnp.float32)
    ln2b = rnd(keys[7], (1, D), 0.1)
    w1 = rnd(keys[8], (4 * D, D))
    b1 = rnd(keys[9], (1, 4 * D), 0.02)
    w2 = rnd(keys[10], (D, 4 * D))
    b2 = rnd(keys[11], (1, D), 0.02)

    # Reference params stay f32.
    params_ref = (ln1g, ln1b, in_proj_w.T, in_proj_b, out_proj_w.T, out_proj_b,
                  ln2g, ln2b, w1.T, b1, w2.T, b2)

    # Kernel params: big matmul weights in bf16 (halves weight DMA, 2x MXU rate);
    # LN params and biases stay f32.
    bf16 = jnp.bfloat16
    params_kernel = (ln1g, ln1b,
                     in_proj_w.T.astype(bf16), in_proj_b,
                     out_proj_w.T.astype(bf16), out_proj_b,
                     ln2g, ln2b,
                     w1.T.astype(bf16), b1,
                     w2.T.astype(bf16), b2)

    x = jax.random.normal(keys[12], (B, S, D), dtype=jnp.float32)

    out = jax.block_until_ready(transformer_block(x, params_kernel, H))
    ref = transformer_block_reference(x, params_ref, H)

    # Tolerance accounts for bf16 matmul inputs / weights + approx reciprocal.
    if not bool(jnp.allclose(out, ref, atol=2e-2, rtol=2e-2)):
        err = float(jnp.max(jnp.abs(out - ref)))
        raise AssertionError(f"Pallas kernel output mismatch vs JAX reference "
                             f"(max abs err = {err})")

    print("KERNEL_OK")
</pallas_src>

<mosaic_0001>
module attributes {stable_mosaic.version = 11 : i64} {
  func.func @transformer_block_kernel(%arg0: i32, %arg1: memref<16x32xf32, #tpu.memory_space<vmem>>, %arg2: memref<1x32xf32, #tpu.memory_space<vmem>>, %arg3: memref<1x32xf32, #tpu.memory_space<vmem>>, %arg4: memref<32x32xbf16, #tpu.memory_space<vmem>>, %arg5: memref<32x32xbf16, #tpu.memory_space<vmem>>, %arg6: memref<32x32xbf16, #tpu.memory_space<vmem>>, %arg7: memref<1x32xf32, #tpu.memory_space<vmem>>, %arg8: memref<1x32xf32, #tpu.memory_space<vmem>>, %arg9: memref<1x32xf32, #tpu.memory_space<vmem>>, %arg10: memref<8x4x32xbf16, #tpu.memory_space<vmem>>, %arg11: memref<1x32xf32, #tpu.memory_space<vmem>>, %arg12: memref<1x32xf32, #tpu.memory_space<vmem>>, %arg13: memref<1x32xf32, #tpu.memory_space<vmem>>, %arg14: memref<32x128xbf16, #tpu.memory_space<vmem>>, %arg15: memref<1x128xf32, #tpu.memory_space<vmem>>, %arg16: memref<128x32xbf16, #tpu.memory_space<vmem>>, %arg17: memref<1x32xf32, #tpu.memory_space<vmem>>, %arg18: memref<16x32xf32, #tpu.memory_space<vmem>>) attributes {dimension_semantics = [#tpu.dimension_semantics<parallel>], iteration_bounds = array<i64: 1>, scalar_prefetch = 0 : i64, scratch_operands = 0 : i64, tpu.core_type = #tpu.core_type<tc>, window_params = [{transform_indices = @transform_0, window_bounds = array<i64: 16, 32>}, {pipeline_mode = #tpu.pipeline_mode<synchronous>, transform_indices = @transform_1, window_bounds = array<i64: 1, 32>}, {pipeline_mode = #tpu.pipeline_mode<synchronous>, transform_indices = @transform_2, window_bounds = array<i64: 1, 32>}, {pipeline_mode = #tpu.pipeline_mode<synchronous>, transform_indices = @transform_3, window_bounds = array<i64: 32, 32>}, {pipeline_mode = #tpu.pipeline_mode<synchronous>, transform_indices = @transform_4, window_bounds = array<i64: 32, 32>}, {pipeline_mode = #tpu.pipeline_mode<synchronous>, transform_indices = @transform_5, window_bounds = array<i64: 32, 32>}, {pipeline_mode = #tpu.pipeline_mode<synchronous>, transform_indices = @transform_6, window_bounds = array<i64: 1, 32>}, {pipeline_mode = #tpu.pipeline_mode<synchronous>, transform_indices = @transform_7, window_bounds = array<i64: 1, 32>}, {pipeline_mode = #tpu.pipeline_mode<synchronous>, transform_indices = @transform_8, window_bounds = array<i64: 1, 32>}, {pipeline_mode = #tpu.pipeline_mode<synchronous>, transform_indices = @transform_9, window_bounds = array<i64: 8, 4, 32>}, {pipeline_mode = #tpu.pipeline_mode<synchronous>, transform_indices = @transform_10, window_bounds = array<i64: 1, 32>}, {pipeline_mode = #tpu.pipeline_mode<synchronous>, transform_indices = @transform_11, window_bounds = array<i64: 1, 32>}, {pipeline_mode = #tpu.pipeline_mode<synchronous>, transform_indices = @transform_12, window_bounds = array<i64: 1, 32>}, {pipeline_mode = #tpu.pipeline_mode<synchronous>, transform_indices = @transform_13, window_bounds = array<i64: 32, 128>}, {pipeline_mode = #tpu.pipeline_mode<synchronous>, transform_indices = @transform_14, window_bounds = array<i64: 1, 128>}, {pipeline_mode = #tpu.pipeline_mode<synchronous>, transform_indices = @transform_15, window_bounds = array<i64: 128, 32>}, {pipeline_mode = #tpu.pipeline_mode<synchronous>, transform_indices = @transform_16, window_bounds = array<i64: 1, 32>}, {transform_indices = @transform_17, window_bounds = array<i64: 16, 32>}]} {
    %c0 = arith.constant 0 : index
    %c0_0 = arith.constant 0 : index
    %0 = vector.load %arg1[%c0, %c0_0] : memref<16x32xf32, #tpu.memory_space<vmem>>, vector<16x32xf32>
    %c0_1 = arith.constant 0 : index
    %c0_2 = arith.constant 0 : index
    %1 = vector.load %arg2[%c0_1, %c0_2] : memref<1x32xf32, #tpu.memory_space<vmem>>, vector<1x32xf32>
    %c0_3 = arith.constant 0 : index
    %c0_4 = arith.constant 0 : index
    %2 = vector.load %arg3[%c0_3, %c0_4] : memref<1x32xf32, #tpu.memory_space<vmem>>, vector<1x32xf32>
    %cst = arith.constant dense<0.000000e+00> : vector<16xf32>
    %3 = vector.multi_reduction <add>, %0, %cst [1] : vector<16x32xf32> to vector<16xf32>
    %4 = vector.shape_cast %3 : vector<16xf32> to vector<16x1xf32>
    %cst_5 = arith.constant 3.200000e+01 : f32
    %5 = vector.broadcast %cst_5 : f32 to vector<16x1xf32>
    %6 = arith.divf %4, %5 : vector<16x1xf32>
    %7 = vector.broadcast %6 : vector<16x1xf32> to vector<16x32xf32>
    %8 = arith.subf %0, %7 : vector<16x32xf32>
    %9 = arith.mulf %8, %8 : vector<16x32xf32>
    %cst_6 = arith.constant dense<0.000000e+00> : vector<16xf32>
    %10 = vector.multi_reduction <add>, %9, %cst_6 [1] : vector<16x32xf32> to vector<16xf32>
    %11 = vector.shape_cast %10 : vector<16xf32> to vector<16x1xf32>
    %cst_7 = arith.constant 3.200000e+01 : f32
    %12 = vector.broadcast %cst_7 : f32 to vector<16x1xf32>
    %13 = arith.divf %11, %12 : vector<16x1xf32>
    %14 = vector.broadcast %6 : vector<16x1xf32> to vector<16x32xf32>
    %15 = arith.subf %0, %14 : vector<16x32xf32>
    %cst_8 = arith.constant 9.99999974E-6 : f32
    %16 = vector.broadcast %cst_8 : f32 to vector<16x1xf32>
    %17 = arith.addf %13, %16 : vector<16x1xf32>
    %18 = math.rsqrt %17 : vector<16x1xf32>
    %19 = vector.broadcast %18 : vector<16x1xf32> to vector<16x32xf32>
    %20 = arith.mulf %15, %19 : vector<16x32xf32>
    %21 = vector.broadcast %1 : vector<1x32xf32> to vector<16x32xf32>
    %22 = arith.mulf %20, %21 : vector<16x32xf32>
    %23 = vector.broadcast %2 : vector<1x32xf32> to vector<16x32xf32>
    %24 = arith.addf %22, %23 : vector<16x32xf32>
    %25 = arith.truncf %24 : vector<16x32xf32> to vector<16x32xbf16>
    %c0_9 = arith.constant 0 : index
    %c0_10 = arith.constant 0 : index
    %26 = vector.load %arg4[%c0_9, %c0_10] : memref<32x32xbf16, #tpu.memory_space<vmem>>, vector<32x32xbf16>
    %cst_11 = arith.constant dense<0.000000e+00> : vector<16x32xf32>
    %27 = tpu.matmul %25, %26, %cst_11 {dimension_numbers = #tpu.dot_dimension_numbers<[1], [0], [0], [1], [0, 0, 1, 1], [], []>} : vector<16x32xbf16>, vector<32x32xbf16>, vector<16x32xf32> -> vector<16x32xf32>
    %c0_12 = arith.constant 0 : index
    %c0_13 = arith.constant 0 : index
    %28 = vector.load %arg7[%c0_12, %c0_13] : memref<1x32xf32, #tpu.memory_space<vmem>>, vector<1x32xf32>
    %29 = vector.broadcast %28 : vector<1x32xf32> to vector<16x32xf32>
    %30 = arith.addf %27, %29 : vector<16x32xf32>
    %c0_14 = arith.constant 0 : index
    %c0_15 = arith.constant 0 : index
    %31 = vector.load %arg5[%c0_14, %c0_15] : memref<32x32xbf16, #tpu.memory_space<vmem>>, vector<32x32xbf16>
    %cst_16 = arith.constant dense<0.000000e+00> : vector<16x32xf32>
    %32 = tpu.matmul %25, %31, %cst_16 {dimension_numbers = #tpu.dot_dimension_numbers<[1], [0], [0], [1], [0, 0, 1, 1], [], []>} : vector<16x32xbf16>, vector<32x32xbf16>, vector<16x32xf32> -> vector<16x32xf32>
    %c0_17 = arith.constant 0 : index
    %c0_18 = arith.constant 0 : index
    %33 = vector.load %arg8[%c0_17, %c0_18] : memref<1x32xf32, #tpu.memory_space<vmem>>, vector<1x32xf32>
    %34 = vector.broadcast %33 : vector<1x32xf32> to vector<16x32xf32>
    %35 = arith.addf %32, %34 : vector<16x32xf32>
    %c0_19 = arith.constant 0 : index
    %c0_20 = arith.constant 0 : index
    %36 = vector.load %arg6[%c0_19, %c0_20] : memref<32x32xbf16, #tpu.memory_space<vmem>>, vector<32x32xbf16>
    %cst_21 = arith.constant dense<0.000000e+00> : vector<16x32xf32>
    %37 = tpu.matmul %25, %36, %cst_21 {dimension_numbers = #tpu.dot_dimension_numbers<[1], [0], [0], [1], [0, 0, 1, 1], [], []>} : vector<16x32xbf16>, vector<32x32xbf16>, vector<16x32xf32> -> vector<16x32xf32>
    %c0_22 = arith.constant 0 : index
    %c0_23 = arith.constant 0 : index
    %38 = vector.load %arg9[%c0_22, %c0_23] : memref<1x32xf32, #tpu.memory_space<vmem>>, vector<1x32xf32>
    %39 = vector.broadcast %38 : vector<1x32xf32> to vector<16x32xf32>
    %40 = arith.addf %37, %39 : vector<16x32xf32>
    %cst_24 = arith.constant 5.000000e-01 : f32
    %41 = vector.broadcast %cst_24 : f32 to vector<16x32xf32>
    %42 = arith.mulf %30, %41 : vector<16x32xf32>
    %43 = vector.shape_cast %42 : vector<16x32xf32> to vector<2x8x32xf32>
    %44 = vector.shape_cast %35 : vector<16x32xf32> to vector<2x8x32xf32>
    %45 = vector.shape_cast %40 : vector<16x32xf32> to vector<2x8x32xf32>
    %46 = vector.extract_strided_slice %43 {offsets = [0, 0, 0], sizes = [2, 8, 4], strides = [1, 1, 1]} : vector<2x8x32xf32> to vector<2x8x4xf32>
    %47 = vector.extract_strided_slice %44 {offsets = [0, 0, 0], sizes = [2, 8, 4], strides = [1, 1, 1]} : vector<2x8x32xf32> to vector<2x8x4xf32>
    %48 = vector.extract_strided_slice %45 {offsets = [0, 0, 0], sizes = [2, 8, 4], strides = [1, 1, 1]} : vector<2x8x32xf32> to vector<2x8x4xf32>
    "tpu.trace_start"() <{level = 10 : i32, message = "bqd,bkd->bqk"}> : () -> ()
    %cst_25 = arith.constant dense<0.000000e+00> : vector<2x8x8xf32>
    %49 = tpu.matmul %46, %47, %cst_25 {dimension_numbers = #tpu.dot_dimension_numbers<[2], [2], [1], [1], [0, 0, 0, 1, 1, 1], [0], [0]>} : vector<2x8x4xf32>, vector<2x8x4xf32>, vector<2x8x8xf32> -> vector<2x8x8xf32>
    "tpu.trace_stop"() : () -> ()
    %cst_26 = arith.constant dense<0xFF800000> : vector<2x8xf32>
    %50 = vector.multi_reduction <maximumf>, %49, %cst_26 [2] : vector<2x8x8xf32> to vector<2x8xf32>
    %51 = vector.shape_cast %50 : vector<2x8xf32> to vector<2x8x1xf32>
    %52 = vector.broadcast %51 : vector<2x8x1xf32> to vector<2x8x8xf32>
    %53 = arith.subf %49, %52 : vector<2x8x8xf32>
    %54 = math.exp %53 : vector<2x8x8xf32>
    %cst_27 = arith.constant dense<0.000000e+00> : vector<2x8xf32>
    %55 = vector.multi_reduction <add>, %54, %cst_27 [2] : vector<2x8x8xf32> to vector<2x8xf32>
    %56 = vector.shape_cast %55 : vector<2x8xf32> to vector<2x8x1xf32>
    %57 = tpu.reciprocal %56 {approx = true} : vector<2x8x1xf32> -> vector<2x8x1xf32>
    %58 = vector.broadcast %57 : vector<2x8x1xf32> to vector<2x8x8xf32>
    %59 = arith.mulf %54, %58 : vector<2x8x8xf32>
    "tpu.trace_start"() <{level = 10 : i32, message = "bqk,bkd->bqd"}> : () -> ()
    %cst_28 = arith.constant dense<0.000000e+00> : vector<2x8x4xf32>
    %60 = tpu.matmul %59, %48, %cst_28 {dimension_numbers = #tpu.dot_dimension_numbers<[2], [1], [1], [2], [0, 0, 0, 1, 1, 2], [0], [0]>} : vector<2x8x8xf32>, vector<2x8x4xf32>, vector<2x8x4xf32> -> vector<2x8x4xf32>
    "tpu.trace_stop"() : () -> ()
    %61 = vector.shape_cast %60 : vector<2x8x4xf32> to vector<16x4xf32>
    %62 = arith.truncf %61 : vector<16x4xf32> to vector<16x4xbf16>
    %c0_29 = arith.constant 0 : index
    %c0_30 = arith.constant 0 : index
    %c0_31 = arith.constant 0 : index
    %63 = vector.load %arg10[%c0_29, %c0_30, %c0_31] : memref<8x4x32xbf16, #tpu.memory_space<vmem>>, vector<1x4x32xbf16>
    %64 = vector.shape_cast %63 : vector<1x4x32xbf16> to vector<4x32xbf16>
    %cst_32 = arith.constant dense<0.000000e+00> : vector<16x32xf32>
    %65 = tpu.matmul %62, %64, %cst_32 {dimension_numbers = #tpu.dot_dimension_numbers<[1], [0], [0], [1], [0, 0, 1, 1], [], []>} : vector<16x4xbf16>, vector<4x32xbf16>, vector<16x32xf32> -> vector<16x32xf32>
    %66 = arith.addf %0, %65 : vector<16x32xf32>
    %67 = vector.extract_strided_slice %43 {offsets = [0, 0, 4], sizes = [2, 8, 4], strides = [1, 1, 1]} : vector<2x8x32xf32> to vector<2x8x4xf32>
    %68 = vector.extract_strided_slice %44 {offsets = [0, 0, 4], sizes = [2, 8, 4], strides = [1, 1, 1]} : vector<2x8x32xf32> to vector<2x8x4xf32>
    %69 = vector.extract_strided_slice %45 {offsets = [0, 0, 4], sizes = [2, 8, 4], strides = [1, 1, 1]} : vector<2x8x32xf32> to vector<2x8x4xf32>
    "tpu.trace_start"() <{level = 10 : i32, message = "bqd,bkd->bqk"}> : () -> ()
    %cst_33 = arith.constant dense<0.000000e+00> : vector<2x8x8xf32>
    %70 = tpu.matmul %67, %68, %cst_33 {dimension_numbers = #tpu.dot_dimension_numbers<[2], [2], [1], [1], [0, 0, 0, 1, 1, 1], [0], [0]>} : vector<2x8x4xf32>, vector<2x8x4xf32>, vector<2x8x8xf32> -> vector<2x8x8xf32>
    "tpu.trace_stop"() : () -> ()
    %cst_34 = arith.constant dense<0xFF800000> : vector<2x8xf32>
    %71 = vector.multi_reduction <maximumf>, %70, %cst_34 [2] : vector<2x8x8xf32> to vector<2x8xf32>
    %72 = vector.shape_cast %71 : vector<2x8xf32> to vector<2x8x1xf32>
    %73 = vector.broadcast %72 : vector<2x8x1xf32> to vector<2x8x8xf32>
    %74 = arith.subf %70, %73 : vector<2x8x8xf32>
    %75 = math.exp %74 : vector<2x8x8xf32>
    %cst_35 = arith.constant dense<0.000000e+00> : vector<2x8xf32>
    %76 = vector.multi_reduction <add>, %75, %cst_35 [2] : vector<2x8x8xf32> to vector<2x8xf32>
    %77 = vector.shape_cast %76 : vector<2x8xf32> to vector<2x8x1xf32>
    %78 = tpu.reciprocal %77 {approx = true} : vector<2x8x1xf32> -> vector<2x8x1xf32>
    %79 = vector.broadcast %78 : vector<2x8x1xf32> to vector<2x8x8xf32>
    %80 = arith.mulf %75, %79 : vector<2x8x8xf32>
    "tpu.trace_start"() <{level = 10 : i32, message = "bqk,bkd->bqd"}> : () -> ()
    %cst_36 = arith.constant dense<0.000000e+00> : vector<2x8x4xf32>
    %81 = tpu.matmul %80, %69, %cst_36 {dimension_numbers = #tpu.dot_dimension_numbers<[2], [1], [1], [2], [0, 0, 0, 1, 1, 2], [0], [0]>} : vector<2x8x8xf32>, vector<2x8x4xf32>, vector<2x8x4xf32> -> vector<2x8x4xf32>
    "tpu.trace_stop"() : () -> ()
    %82 = vector.shape_cast %81 : vector<2x8x4xf32> to vector<16x4xf32>
    %83 = arith.truncf %82 : vector<16x4xf32> to vector<16x4xbf16>
    %c1 = arith.constant 1 : index
    %c0_37 = arith.constant 0 : index
    %c0_38 = arith.constant 0 : index
    %84 = vector.load %arg10[%c1, %c0_37, %c0_38] : memref<8x4x32xbf16, #tpu.memory_space<vmem>>, vector<1x4x32xbf16>
    %85 = vector.shape_cast %84 : vector<1x4x32xbf16> to vector<4x32xbf16>
    %cst_39 = arith.constant dense<0.000000e+00> : vector<16x32xf32>
    %86 = tpu.matmul %83, %85, %cst_39 {dimension_numbers = #tpu.dot_dimension_numbers<[1], [0], [0], [1], [0, 0, 1, 1], [], []>} : vector<16x4xbf16>, vector<4x32xbf16>, vector<16x32xf32> -> vector<16x32xf32>
    %87 = arith.addf %66, %86 : vector<16x32xf32>
    %88 = vector.extract_strided_slice %43 {offsets = [0, 0, 8], sizes = [2, 8, 4], strides = [1, 1, 1]} : vector<2x8x32xf32> to vector<2x8x4xf32>
    %89 = vector.extract_strided_slice %44 {offsets = [0, 0, 8], sizes = [2, 8, 4], strides = [1, 1, 1]} : vector<2x8x32xf32> to vector<2x8x4xf32>
    %90 = vector.extract_strided_slice %45 {offsets = [0, 0, 8], sizes = [2, 8, 4], strides = [1, 1, 1]} : vector<2x8x32xf32> to vector<2x8x4xf32>
    "tpu.trace_start"() <{level = 10 : i32, message = "bqd,bkd->bqk"}> : () -> ()
    %cst_40 = arith.constant dense<0.000000e+00> : vector<2x8x8xf32>
    %91 = tpu.matmul %88, %89, %cst_40 {dimension_numbers = #tpu.dot_dimension_numbers<[2], [2], [1], [1], [0, 0, 0, 1, 1, 1], [0], [0]>} : vector<2x8x4xf32>, vector<2x8x4xf32>, vector<2x8x8xf32> -> vector<2x8x8xf32>
    "tpu.trace_stop"() : () -> ()
    %cst_41 = arith.constant dense<0xFF800000> : vector<2x8xf32>
    %92 = vector.multi_reduction <maximumf>, %91, %cst_41 [2] : vector<2x8x8xf32> to vector<2x8xf32>
    %93 = vector.shape_cast %92 : vector<2x8xf32> to vector<2x8x1xf32>
    %94 = vector.broadcast %93 : vector<2x8x1xf32> to vector<2x8x8xf32>
    %95 = arith.subf %91, %94 : vector<2x8x8xf32>
    %96 = math.exp %95 : vector<2x8x8xf32>
    %cst_42 = arith.constant dense<0.000000e+00> : vector<2x8xf32>
    %97 = vector.multi_reduction <add>, %96, %cst_42 [2] : vector<2x8x8xf32> to vector<2x8xf32>
    %98 = vector.shape_cast %97 : vector<2x8xf32> to vector<2x8x1xf32>
    %99 = tpu.reciprocal %98 {approx = true} : vector<2x8x1xf32> -> vector<2x8x1xf32>
    %100 = vector.broadcast %99 : vector<2x8x1xf32> to vector<2x8x8xf32>
    %101 = arith.mulf %96, %100 : vector<2x8x8xf32>
    "tpu.trace_start"() <{level = 10 : i32, message = "bqk,bkd->bqd"}> : () -> ()
    %cst_43 = arith.constant dense<0.000000e+00> : vector<2x8x4xf32>
    %102 = tpu.matmul %101, %90, %cst_43 {dimension_numbers = #tpu.dot_dimension_numbers<[2], [1], [1], [2], [0, 0, 0, 1, 1, 2], [0], [0]>} : vector<2x8x8xf32>, vector<2x8x4xf32>, vector<2x8x4xf32> -> vector<2x8x4xf32>
    "tpu.trace_stop"() : () -> ()
    %103 = vector.shape_cast %102 : vector<2x8x4xf32> to vector<16x4xf32>
    %104 = arith.truncf %103 : vector<16x4xf32> to vector<16x4xbf16>
    %c2 = arith.constant 2 : index
    %c0_44 = arith.constant 0 : index
    %c0_45 = arith.constant 0 : index
    %105 = vector.load %arg10[%c2, %c0_44, %c0_45] : memref<8x4x32xbf16, #tpu.memory_space<vmem>>, vector<1x4x32xbf16>
    %106 = vector.shape_cast %105 : vector<1x4x32xbf16> to vector<4x32xbf16>
    %cst_46 = arith.constant dense<0.000000e+00> : vector<16x32xf32>
    %107 = tpu.matmul %104, %106, %cst_46 {dimension_numbers = #tpu.dot_dimension_numbers<[1], [0], [0], [1], [0, 0, 1, 1], [], []>} : vector<16x4xbf16>, vector<4x32xbf16>, vector<16x32xf32> -> vector<16x32xf32>
    %108 = arith.addf %87, %107 : vector<16x32xf32>
    %109 = vector.extract_strided_slice %43 {offsets = [0, 0, 12], sizes = [2, 8, 4], strides = [1, 1, 1]} : vector<2x8x32xf32> to vector<2x8x4xf32>
    %110 = vector.extract_strided_slice %44 {offsets = [0, 0, 12], sizes = [2, 8, 4], strides = [1, 1, 1]} : vector<2x8x32xf32> to vector<2x8x4xf32>
    %111 = vector.extract_strided_slice %45 {offsets = [0, 0, 12], sizes = [2, 8, 4], strides = [1, 1, 1]} : vector<2x8x32xf32> to vector<2x8x4xf32>
    "tpu.trace_start"() <{level = 10 : i32, message = "bqd,bkd->bqk"}> : () -> ()
    %cst_47 = arith.constant dense<0.000000e+00> : vector<2x8x8xf32>
    %112 = tpu.matmul %109, %110, %cst_47 {dimension_numbers = #tpu.dot_dimension_numbers<[2], [2], [1], [1], [0, 0, 0, 1, 1, 1], [0], [0]>} : vector<2x8x4xf32>, vector<2x8x4xf32>, vector<2x8x8xf32> -> vector<2x8x8xf32>
    "tpu.trace_stop"() : () -> ()
    %cst_48 = arith.constant dense<0xFF800000> : vector<2x8xf32>
    %113 = vector.multi_reduction <maximumf>, %112, %cst_48 [2] : vector<2x8x8xf32> to vector<2x8xf32>
    %114 = vector.shape_cast %113 : vector<2x8xf32> to vector<2x8x1xf32>
    %115 = vector.broadcast %114 : vector<2x8x1xf32> to vector<2x8x8xf32>
    %116 = arith.subf %112, %115 : vector<2x8x8xf32>
    %117 = math.exp %116 : vector<2x8x8xf32>
    %cst_49 = arith.constant dense<0.000000e+00> : vector<2x8xf32>
    %118 = vector.multi_reduction <add>, %117, %cst_49 [2] : vector<2x8x8xf32> to vector<2x8xf32>
    %119 = vector.shape_cast %118 : vector<2x8xf32> to vector<2x8x1xf32>
    %120 = tpu.reciprocal %119 {approx = true} : vector<2x8x1xf32> -> vector<2x8x1xf32>
    %121 = vector.broadcast %120 : vector<2x8x1xf32> to vector<2x8x8xf32>
    %122 = arith.mulf %117, %121 : vector<2x8x8xf32>
    "tpu.trace_start"() <{level = 10 : i32, message = "bqk,bkd->bqd"}> : () -> ()
    %cst_50 = arith.constant dense<0.000000e+00> : vector<2x8x4xf32>
    %123 = tpu.matmul %122, %111, %cst_50 {dimension_numbers = #tpu.dot_dimension_numbers<[2], [1], [1], [2], [0, 0, 0, 1, 1, 2], [0], [0]>} : vector<2x8x8xf32>, vector<2x8x4xf32>, vector<2x8x4xf32> -> vector<2x8x4xf32>
    "tpu.trace_stop"() : () -> ()
    %124 = vector.shape_cast %123 : vector<2x8x4xf32> to vector<16x4xf32>
    %125 = arith.truncf %124 : vector<16x4xf32> to vector<16x4xbf16>
    %c3 = arith.constant 3 : index
    %c0_51 = arith.constant 0 : index
    %c0_52 = arith.constant 0 : index
    %126 = vector.load %arg10[%c3, %c0_51, %c0_52] : memref<8x4x32xbf16, #tpu.memory_space<vmem>>, vector<1x4x32xbf16>
    %127 = vector.shape_cast %126 : vector<1x4x32xbf16> to vector<4x32xbf16>
    %cst_53 = arith.constant dense<0.000000e+00> : vector<16x32xf32>
    %128 = tpu.matmul %125, %127, %cst_53 {dimension_numbers = #tpu.dot_dimension_numbers<[1], [0], [0], [1], [0, 0, 1, 1], [], []>} : vector<16x4xbf16>, vector<4x32xbf16>, vector<16x32xf32> -> vector<16x32xf32>
    %129 = arith.addf %108, %128 : vector<16x32xf32>
    %130 = vector.extract_strided_slice %43 {offsets = [0, 0, 16], sizes = [2, 8, 4], strides = [1, 1, 1]} : vector<2x8x32xf32> to vector<2x8x4xf32>
    %131 = vector.extract_strided_slice %44 {offsets = [0, 0, 16], sizes = [2, 8, 4], strides = [1, 1, 1]} : vector<2x8x32xf32> to vector<2x8x4xf32>
    %132 = vector.extract_strided_slice %45 {offsets = [0, 0, 16], sizes = [2, 8, 4], strides = [1, 1, 1]} : vector<2x8x32xf32> to vector<2x8x4xf32>
    "tpu.trace_start"() <{level = 10 : i32, message = "bqd,bkd->bqk"}> : () -> ()
    %cst_54 = arith.constant dense<0.000000e+00> : vector<2x8x8xf32>
    %133 = tpu.matmul %130, %131, %cst_54 {dimension_numbers = #tpu.dot_dimension_numbers<[2], [2], [1], [1], [0, 0, 0, 1, 1, 1], [0], [0]>} : vector<2x8x4xf32>, vector<2x8x4xf32>, vector<2x8x8xf32> -> vector<2x8x8xf32>
    "tpu.trace_stop"() : () -> ()
    %cst_55 = arith.constant dense<0xFF800000> : vector<2x8xf32>
    %134 = vector.multi_reduction <maximumf>, %133, %cst_55 [2] : vector<2x8x8xf32> to vector<2x8xf32>
    %135 = vector.shape_cast %134 : vector<2x8xf32> to vector<2x8x1xf32>
    %136 = vector.broadcast %135 : vector<2x8x1xf32> to vector<2x8x8xf32>
    %137 = arith.subf %133, %136 : vector<2x8x8xf32>
    %138 = math.exp %137 : vector<2x8x8xf32>
    %cst_56 = arith.constant dense<0.000000e+00> : vector<2x8xf32>
    %139 = vector.multi_reduction <add>, %138, %cst_56 [2] : vector<2x8x8xf32> to vector<2x8xf32>
    %140 = vector.shape_cast %139 : vector<2x8xf32> to vector<2x8x1xf32>
    %141 = tpu.reciprocal %140 {approx = true} : vector<2x8x1xf32> -> vector<2x8x1xf32>
    %142 = vector.broadcast %141 : vector<2x8x1xf32> to vector<2x8x8xf32>
    %143 = arith.mulf %138, %142 : vector<2x8x8xf32>
    "tpu.trace_start"() <{level = 10 : i32, message = "bqk,bkd->bqd"}> : () -> ()
    %cst_57 = arith.constant dense<0.000000e+00> : vector<2x8x4xf32>
    %144 = tpu.matmul %143, %132, %cst_57 {dimension_numbers = #tpu.dot_dimension_numbers<[2], [1], [1], [2], [0, 0, 0, 1, 1, 2], [0], [0]>} : vector<2x8x8xf32>, vector<2x8x4xf32>, vector<2x8x4xf32> -> vector<2x8x4xf32>
    "tpu.trace_stop"() : () -> ()
    %145 = vector.shape_cast %144 : vector<2x8x4xf32> to vector<16x4xf32>
    %146 = arith.truncf %145 : vector<16x4xf32> to vector<16x4xbf16>
    %c4 = arith.constant 4 : index
    %c0_58 = arith.constant 0 : index
    %c0_59 = arith.constant 0 : index
    %147 = vector.load %arg10[%c4, %c0_58, %c0_59] : memref<8x4x32xbf16, #tpu.memory_space<vmem>>, vector<1x4x32xbf16>
    %148 = vector.shape_cast %147 : vector<1x4x32xbf16> to vector<4x32xbf16>
    %cst_60 = arith.constant dense<0.000000e+00> : vector<16x32xf32>
    %149 = tpu.matmul %146, %148, %cst_60 {dimension_numbers = #tpu.dot_dimension_numbers<[1], [0], [0], [1], [0, 0, 1, 1], [], []>} : vector<16x4xbf16>, vector<4x32xbf16>, vector<16x32xf32> -> vector<16x32xf32>
    %150 = arith.addf %129, %149 : vector<16x32xf32>
    %151 = vector.extract_strided_slice %43 {offsets = [0, 0, 20], sizes = [2, 8, 4], strides = [1, 1, 1]} : vector<2x8x32xf32> to vector<2x8x4xf32>
    %152 = vector.extract_strided_slice %44 {offsets = [0, 0, 20], sizes = [2, 8, 4], strides = [1, 1, 1]} : vector<2x8x32xf32> to vector<2x8x4xf32>
    %153 = vector.extract_strided_slice %45 {offsets = [0, 0, 20], sizes = [2, 8, 4], strides = [1, 1, 1]} : vector<2x8x32xf32> to vector<2x8x4xf32>
    "tpu.trace_start"() <{level = 10 : i32, message = "bqd,bkd->bqk"}> : () -> ()
    %cst_61 = arith.constant dense<0.000000e+00> : vector<2x8x8xf32>
    %154 = tpu.matmul %151, %152, %cst_61 {dimension_numbers = #tpu.dot_dimension_numbers<[2], [2], [1], [1], [0, 0, 0, 1, 1, 1], [0], [0]>} : vector<2x8x4xf32>, vector<2x8x4xf32>, vector<2x8x8xf32> -> vector<2x8x8xf32>
    "tpu.trace_stop"() : () -> ()
    %cst_62 = arith.constant dense<0xFF800000> : vector<2x8xf32>
    %155 = vector.multi_reduction <maximumf>, %154, %cst_62 [2] : vector<2x8x8xf32> to vector<2x8xf32>
    %156 = vector.shape_cast %155 : vector<2x8xf32> to vector<2x8x1xf32>
    %157 = vector.broadcast %156 : vector<2x8x1xf32> to vector<2x8x8xf32>
    %158 = arith.subf %154, %157 : vector<2x8x8xf32>
    %159 = math.exp %158 : vector<2x8x8xf32>
    %cst_63 = arith.constant dense<0.000000e+00> : vector<2x8xf32>
    %160 = vector.multi_reduction <add>, %159, %cst_63 [2] : vector<2x8x8xf32> to vector<2x8xf32>
    %161 = vector.shape_cast %160 : vector<2x8xf32> to vector<2x8x1xf32>
    %162 = tpu.reciprocal %161 {approx = true} : vector<2x8x1xf32> -> vector<2x8x1xf32>
    %163 = vector.broadcast %162 : vector<2x8x1xf32> to vector<2x8x8xf32>
    %164 = arith.mulf %159, %163 : vector<2x8x8xf32>
    "tpu.trace_start"() <{level = 10 : i32, message = "bqk,bkd->bqd"}> : () -> ()
    %cst_64 = arith.constant dense<0.000000e+00> : vector<2x8x4xf32>
    %165 = tpu.matmul %164, %153, %cst_64 {dimension_numbers = #tpu.dot_dimension_numbers<[2], [1], [1], [2], [0, 0, 0, 1, 1, 2], [0], [0]>} : vector<2x8x8xf32>, vector<2x8x4xf32>, vector<2x8x4xf32> -> vector<2x8x4xf32>
    "tpu.trace_stop"() : () -> ()
    %166 = vector.shape_cast %165 : vector<2x8x4xf32> to vector<16x4xf32>
    %167 = arith.truncf %166 : vector<16x4xf32> to vector<16x4xbf16>
    %c5 = arith.constant 5 : index
    %c0_65 = arith.constant 0 : index
    %c0_66 = arith.constant 0 : index
    %168 = vector.load %arg10[%c5, %c0_65, %c0_66] : memref<8x4x32xbf16, #tpu.memory_space<vmem>>, vector<1x4x32xbf16>
    %169 = vector.shape_cast %168 : vector<1x4x32xbf16> to vector<4x32xbf16>
    %cst_67 = arith.constant dense<0.000000e+00> : vector<16x32xf32>
    %170 = tpu.matmul %167, %169, %cst_67 {dimension_numbers = #tpu.dot_dimension_numbers<[1], [0], [0], [1], [0, 0, 1, 1], [], []>} : vector<16x4xbf16>, vector<4x32xbf16>, vector<16x32xf32> -> vector<16x32xf32>
    %171 = arith.addf %150, %170 : vector<16x32xf32>
    %172 = vector.extract_strided_slice %43 {offsets = [0, 0, 24], sizes = [2, 8, 4], strides = [1, 1, 1]} : vector<2x8x32xf32> to vector<2x8x4xf32>
    %173 = vector.extract_strided_slice %44 {offsets = [0, 0, 24], sizes = [2, 8, 4], strides = [1, 1, 1]} : vector<2x8x32xf32> to vector<2x8x4xf32>
    %174 = vector.extract_strided_slice %45 {offsets = [0, 0, 24], sizes = [2, 8, 4], strides = [1, 1, 1]} : vector<2x8x32xf32> to vector<2x8x4xf32>
    "tpu.trace_start"() <{level = 10 : i32, message = "bqd,bkd->bqk"}> : () -> ()
    %cst_68 = arith.constant dense<0.000000e+00> : vector<2x8x8xf32>
    %175 = tpu.matmul %172, %173, %cst_68 {dimension_numbers = #tpu.dot_dimension_numbers<[2], [2], [1], [1], [0, 0, 0, 1, 1, 1], [0], [0]>} : vector<2x8x4xf32>, vector<2x8x4xf32>, vector<2x8x8xf32> -> vector<2x8x8xf32>
    "tpu.trace_stop"() : () -> ()
    %cst_69 = arith.constant dense<0xFF800000> : vector<2x8xf32>
    %176 = vector.multi_reduction <maximumf>, %175, %cst_69 [2] : vector<2x8x8xf32> to vector<2x8xf32>
    %177 = vector.shape_cast %176 : vector<2x8xf32> to vector<2x8x1xf32>
    %178 = vector.broadcast %177 : vector<2x8x1xf32> to vector<2x8x8xf32>
    %179 = arith.subf %175, %178 : vector<2x8x8xf32>
    %180 = math.exp %179 : vector<2x8x8xf32>
    %cst_70 = arith.constant dense<0.000000e+00> : vector<2x8xf32>
    %181 = vector.multi_reduction <add>, %180, %cst_70 [2] : vector<2x8x8xf32> to vector<2x8xf32>
    %182 = vector.shape_cast %181 : vector<2x8xf32> to vector<2x8x1xf32>
    %183 = tpu.reciprocal %182 {approx = true} : vector<2x8x1xf32> -> vector<2x8x1xf32>
    %184 = vector.broadcast %183 : vector<2x8x1xf32> to vector<2x8x8xf32>
    %185 = arith.mulf %180, %184 : vector<2x8x8xf32>
    "tpu.trace_start"() <{level = 10 : i32, message = "bqk,bkd->bqd"}> : () -> ()
    %cst_71 = arith.constant dense<0.000000e+00> : vector<2x8x4xf32>
    %186 = tpu.matmul %185, %174, %cst_71 {dimension_numbers = #tpu.dot_dimension_numbers<[2], [1], [1], [2], [0, 0, 0, 1, 1, 2], [0], [0]>} : vector<2x8x8xf32>, vector<2x8x4xf32>, vector<2x8x4xf32> -> vector<2x8x4xf32>
    "tpu.trace_stop"() : () -> ()
    %187 = vector.shape_cast %186 : vector<2x8x4xf32> to vector<16x4xf32>
    %188 = arith.truncf %187 : vector<16x4xf32> to vector<16x4xbf16>
    %c6 = arith.constant 6 : index
    %c0_72 = arith.constant 0 : index
    %c0_73 = arith.constant 0 : index
    %189 = vector.load %arg10[%c6, %c0_72, %c0_73] : memref<8x4x32xbf16, #tpu.memory_space<vmem>>, vector<1x4x32xbf16>
    %190 = vector.shape_cast %189 : vector<1x4x32xbf16> to vector<4x32xbf16>
    %cst_74 = arith.constant dense<0.000000e+00> : vector<16x32xf32>
    %191 = tpu.matmul %188, %190, %cst_74 {dimension_numbers = #tpu.dot_dimension_numbers<[1], [0], [0], [1], [0, 0, 1, 1], [], []>} : vector<16x4xbf16>, vector<4x32xbf16>, vector<16x32xf32> -> vector<16x32xf32>
    %192 = arith.addf %171, %191 : vector<16x32xf32>
    %193 = vector.extract_strided_slice %43 {offsets = [0, 0, 28], sizes = [2, 8, 4], strides = [1, 1, 1]} : vector<2x8x32xf32> to vector<2x8x4xf32>
    %194 = vector.extract_strided_slice %44 {offsets = [0, 0, 28], sizes = [2, 8, 4], strides = [1, 1, 1]} : vector<2x8x32xf32> to vector<2x8x4xf32>
    %195 = vector.extract_strided_slice %45 {offsets = [0, 0, 28], sizes = [2, 8, 4], strides = [1, 1, 1]} : vector<2x8x32xf32> to vector<2x8x4xf32>
    "tpu.trace_start"() <{level = 10 : i32, message = "bqd,bkd->bqk"}> : () -> ()
    %cst_75 = arith.constant dense<0.000000e+00> : vector<2x8x8xf32>
    %196 = tpu.matmul %193, %194, %cst_75 {dimension_numbers = #tpu.dot_dimension_numbers<[2], [2], [1], [1], [0, 0, 0, 1, 1, 1], [0], [0]>} : vector<2x8x4xf32>, vector<2x8x4xf32>, vector<2x8x8xf32> -> vector<2x8x8xf32>
    "tpu.trace_stop"() : () -> ()
    %cst_76 = arith.constant dense<0xFF800000> : vector<2x8xf32>
    %197 = vector.multi_reduction <maximumf>, %196, %cst_76 [2] : vector<2x8x8xf32> to vector<2x8xf32>
    %198 = vector.shape_cast %197 : vector<2x8xf32> to vector<2x8x1xf32>
    %199 = vector.broadcast %198 : vector<2x8x1xf32> to vector<2x8x8xf32>
    %200 = arith.subf %196, %199 : vector<2x8x8xf32>
    %201 = math.exp %200 : vector<2x8x8xf32>
    %cst_77 = arith.constant dense<0.000000e+00> : vector<2x8xf32>
    %202 = vector.multi_reduction <add>, %201, %cst_77 [2] : vector<2x8x8xf32> to vector<2x8xf32>
    %203 = vector.shape_cast %202 : vector<2x8xf32> to vector<2x8x1xf32>
    %204 = tpu.reciprocal %203 {approx = true} : vector<2x8x1xf32> -> vector<2x8x1xf32>
    %205 = vector.broadcast %204 : vector<2x8x1xf32> to vector<2x8x8xf32>
    %206 = arith.mulf %201, %205 : vector<2x8x8xf32>
    "tpu.trace_start"() <{level = 10 : i32, message = "bqk,bkd->bqd"}> : () -> ()
    %cst_78 = arith.constant dense<0.000000e+00> : vector<2x8x4xf32>
    %207 = tpu.matmul %206, %195, %cst_78 {dimension_numbers = #tpu.dot_dimension_numbers<[2], [1], [1], [2], [0, 0, 0, 1, 1, 2], [0], [0]>} : vector<2x8x8xf32>, vector<2x8x4xf32>, vector<2x8x4xf32> -> vector<2x8x4xf32>
    "tpu.trace_stop"() : () -> ()
    %208 = vector.shape_cast %207 : vector<2x8x4xf32> to vector<16x4xf32>
    %209 = arith.truncf %208 : vector<16x4xf32> to vector<16x4xbf16>
    %c7 = arith.constant 7 : index
    %c0_79 = arith.constant 0 : index
    %c0_80 = arith.constant 0 : index
    %210 = vector.load %arg10[%c7, %c0_79, %c0_80] : memref<8x4x32xbf16, #tpu.memory_space<vmem>>, vector<1x4x32xbf16>
    %211 = vector.shape_cast %210 : vector<1x4x32xbf16> to vector<4x32xbf16>
    %cst_81 = arith.constant dense<0.000000e+00> : vector<16x32xf32>
    %212 = tpu.matmul %209, %211, %cst_81 {dimension_numbers = #tpu.dot_dimension_numbers<[1], [0], [0], [1], [0, 0, 1, 1], [], []>} : vector<16x4xbf16>, vector<4x32xbf16>, vector<16x32xf32> -> vector<16x32xf32>
    %213 = arith.addf %192, %212 : vector<16x32xf32>
    %c0_82 = arith.constant 0 : index
    %c0_83 = arith.constant 0 : index
    %214 = vector.load %arg11[%c0_82, %c0_83] : memref<1x32xf32, #tpu.memory_space<vmem>>, vector<1x32xf32>
    %215 = vector.broadcast %214 : vector<1x32xf32> to vector<16x32xf32>
    %216 = arith.addf %213, %215 : vector<16x32xf32>
    %c0_84 = arith.constant 0 : index
    %c0_85 = arith.constant 0 : index
    %217 = vector.load %arg12[%c0_84, %c0_85] : memref<1x32xf32, #tpu.memory_space<vmem>>, vector<1x32xf32>
    %c0_86 = arith.constant 0 : index
    %c0_87 = arith.constant 0 : index
    %218 = vector.load %arg13[%c0_86, %c0_87] : memref<1x32xf32, #tpu.memory_space<vmem>>, vector<1x32xf32>
    %cst_88 = arith.constant dense<0.000000e+00> : vector<16xf32>
    %219 = vector.multi_reduction <add>, %216, %cst_88 [1] : vector<16x32xf32> to vector<16xf32>
    %220 = vector.shape_cast %219 : vector<16xf32> to vector<16x1xf32>
    %cst_89 = arith.constant 3.200000e+01 : f32
    %221 = vector.broadcast %cst_89 : f32 to vector<16x1xf32>
    %222 = arith.divf %220, %221 : vector<16x1xf32>
    %223 = vector.broadcast %222 : vector<16x1xf32> to vector<16x32xf32>
    %224 = arith.subf %216, %223 : vector<16x32xf32>
    %225 = arith.mulf %224, %224 : vector<16x32xf32>
    %cst_90 = arith.constant dense<0.000000e+00> : vector<16xf32>
    %226 = vector.multi_reduction <add>, %225, %cst_90 [1] : vector<16x32xf32> to vector<16xf32>
    %227 = vector.shape_cast %226 : vector<16xf32> to vector<16x1xf32>
    %cst_91 = arith.constant 3.200000e+01 : f32
    %228 = vector.broadcast %cst_91 : f32 to vector<16x1xf32>
    %229 = arith.divf %227, %228 : vector<16x1xf32>
    %230 = vector.broadcast %222 : vector<16x1xf32> to vector<16x32xf32>
    %231 = arith.subf %216, %230 : vector<16x32xf32>
    %cst_92 = arith.constant 9.99999974E-6 : f32
    %232 = vector.broadcast %cst_92 : f32 to vector<16x1xf32>
    %233 = arith.addf %229, %232 : vector<16x1xf32>
    %234 = math.rsqrt %233 : vector<16x1xf32>
    %235 = vector.broadcast %234 : vector<16x1xf32> to vector<16x32xf32>
    %236 = arith.mulf %231, %235 : vector<16x32xf32>
    %237 = vector.broadcast %217 : vector<1x32xf32> to vector<16x32xf32>
    %238 = arith.mulf %236, %237 : vector<16x32xf32>
    %239 = vector.broadcast %218 : vector<1x32xf32> to vector<16x32xf32>
    %240 = arith.addf %238, %239 : vector<16x32xf32>
    %241 = arith.truncf %240 : vector<16x32xf32> to vector<16x32xbf16>
    %c0_93 = arith.constant 0 : index
    %c0_94 = arith.constant 0 : index
    %242 = vector.load %arg14[%c0_93, %c0_94] : memref<32x128xbf16, #tpu.memory_space<vmem>>, vector<32x128xbf16>
    %cst_95 = arith.constant dense<0.000000e+00> : vector<16x128xf32>
    %243 = tpu.matmul %241, %242, %cst_95 {dimension_numbers = #tpu.dot_dimension_numbers<[1], [0], [0], [1], [0, 0, 1, 1], [], []>} : vector<16x32xbf16>, vector<32x128xbf16>, vector<16x128xf32> -> vector<16x128xf32>
    %c0_96 = arith.constant 0 : index
    %c0_97 = arith.constant 0 : index
    %244 = vector.load %arg15[%c0_96, %c0_97] : memref<1x128xf32, #tpu.memory_space<vmem>>, vector<1x128xf32>
    %245 = vector.broadcast %244 : vector<1x128xf32> to vector<16x128xf32>
    %246 = arith.addf %243, %245 : vector<16x128xf32>
    %cst_98 = arith.constant 5.000000e-01 : f32
    %247 = vector.broadcast %cst_98 : f32 to vector<16x128xf32>
    %248 = arith.mulf %247, %246 : vector<16x128xf32>
    %cst_99 = arith.constant 0.707106769 : f32
    %249 = vector.broadcast %cst_99 : f32 to vector<16x128xf32>
    %250 = arith.mulf %246, %249 : vector<16x128xf32>
    %251 = math.erf %250 : vector<16x128xf32>
    %cst_100 = arith.constant 1.000000e+00 : f32
    %252 = vector.broadcast %cst_100 : f32 to vector<16x128xf32>
    %253 = arith.addf %252, %251 : vector<16x128xf32>
    %254 = arith.mulf %248, %253 : vector<16x128xf32>
    %255 = arith.truncf %254 : vector<16x128xf32> to vector<16x128xbf16>
    %c0_101 = arith.constant 0 : index
    %c0_102 = arith.constant 0 : index
    %256 = vector.load %arg16[%c0_101, %c0_102] : memref<128x32xbf16, #tpu.memory_space<vmem>>, vector<128x32xbf16>
    %cst_103 = arith.constant dense<0.000000e+00> : vector<16x32xf32>
    %257 = tpu.matmul %255, %256, %cst_103 {dimension_numbers = #tpu.dot_dimension_numbers<[1], [0], [0], [1], [0, 0, 1, 1], [], []>} : vector<16x128xbf16>, vector<128x32xbf16>, vector<16x32xf32> -> vector<16x32xf32>
    %c0_104 = arith.constant 0 : index
    %c0_105 = arith.constant 0 : index
    %258 = vector.load %arg17[%c0_104, %c0_105] : memref<1x32xf32, #tpu.memory_space<vmem>>, vector<1x32xf32>
    %259 = vector.broadcast %258 : vector<1x32xf32> to vector<16x32xf32>
    %260 = arith.addf %257, %259 : vector<16x32xf32>
    %261 = arith.addf %216, %260 : vector<16x32xf32>
    %c0_106 = arith.constant 0 : index
    %c0_107 = arith.constant 0 : index
    %262 = vector.load %arg18[%c0_106, %c0_107] : memref<16x32xf32, #tpu.memory_space<vmem>>, vector<16x32xf32>
    tpu.vector_store %arg18[%c0_106, %c0_107], %261 {strides = array<i32>} : memref<16x32xf32, #tpu.memory_space<vmem>>, vector<16x32xf32>,
    return
  }
  func.func @transform_0(%arg0: i32) -> (i32, i32) {
    %c0_i32 = arith.constant 0 : i32
    %c0_i32_0 = arith.constant 0 : i32
    return %arg0, %c0_i32 : i32, i32
  }
  func.func @transform_1(%arg0: i32) -> (i32, i32) {
    %c0_i32 = arith.constant 0 : i32
    %c0_i32_0 = arith.constant 0 : i32
    %c0_i32_1 = arith.constant 0 : i32
    return %c0_i32, %c0_i32_0 : i32, i32
  }
  func.func @transform_2(%arg0: i32) -> (i32, i32) {
    %c0_i32 = arith.constant 0 : i32
    %c0_i32_0 = arith.constant 0 : i32
    %c0_i32_1 = arith.constant 0 : i32
    return %c0_i32, %c0_i32_0 : i32, i32
  }
  func.func @transform_3(%arg0: i32) -> (i32, i32) {
    %c0_i32 = arith.constant 0 : i32
    %c0_i32_0 = arith.constant 0 : i32
    %c0_i32_1 = arith.constant 0 : i32
    return %c0_i32, %c0_i32_0 : i32, i32
  }
  func.func @transform_4(%arg0: i32) -> (i32, i32) {
    %c0_i32 = arith.constant 0 : i32
    %c0_i32_0 = arith.constant 0 : i32
    %c0_i32_1 = arith.constant 0 : i32
    return %c0_i32, %c0_i32_0 : i32, i32
  }
  func.func @transform_5(%arg0: i32) -> (i32, i32) {
    %c0_i32 = arith.constant 0 : i32
    %c0_i32_0 = arith.constant 0 : i32
    %c0_i32_1 = arith.constant 0 : i32
    return %c0_i32, %c0_i32_0 : i32, i32
  }
  func.func @transform_6(%arg0: i32) -> (i32, i32) {
    %c0_i32 = arith.constant 0 : i32
    %c0_i32_0 = arith.constant 0 : i32
    %c0_i32_1 = arith.constant 0 : i32
    return %c0_i32, %c0_i32_0 : i32, i32
  }
  func.func @transform_7(%arg0: i32) -> (i32, i32) {
    %c0_i32 = arith.constant 0 : i32
    %c0_i32_0 = arith.constant 0 : i32
    %c0_i32_1 = arith.constant 0 : i32
    return %c0_i32, %c0_i32_0 : i32, i32
  }
  func.func @transform_8(%arg0: i32) -> (i32, i32) {
    %c0_i32 = arith.constant 0 : i32
    %c0_i32_0 = arith.constant 0 : i32
    %c0_i32_1 = arith.constant 0 : i32
    return %c0_i32, %c0_i32_0 : i32, i32
  }
  func.func @transform_9(%arg0: i32) -> (i32, i32, i32) {
    %c0_i32 = arith.constant 0 : i32
    %c0_i32_0 = arith.constant 0 : i32
    %c0_i32_1 = arith.constant 0 : i32
    %c0_i32_2 = arith.constant 0 : i32
    return %c0_i32, %c0_i32_0, %c0_i32_1 : i32, i32, i32
  }
  func.func @transform_10(%arg0: i32) -> (i32, i32) {
    %c0_i32 = arith.constant 0 : i32
    %c0_i32_0 = arith.constant 0 : i32
    %c0_i32_1 = arith.constant 0 : i32
    return %c0_i32, %c0_i32_0 : i32, i32
  }
  func.func @transform_11(%arg0: i32) -> (i32, i32) {
    %c0_i32 = arith.constant 0 : i32
    %c0_i32_0 = arith.constant 0 : i32
    %c0_i32_1 = arith.constant 0 : i32
    return %c0_i32, %c0_i32_0 : i32, i32
  }
  func.func @transform_12(%arg0: i32) -> (i32, i32) {
    %c0_i32 = arith.constant 0 : i32
    %c0_i32_0 = arith.constant 0 : i32
    %c0_i32_1 = arith.constant 0 : i32
    return %c0_i32, %c0_i32_0 : i32, i32
  }
  func.func @transform_13(%arg0: i32) -> (i32, i32) {
    %c0_i32 = arith.constant 0 : i32
    %c0_i32_0 = arith.constant 0 : i32
    %c0_i32_1 = arith.constant 0 : i32
    return %c0_i32, %c0_i32_0 : i32, i32
  }
  func.func @transform_14(%arg0: i32) -> (i32, i32) {
    %c0_i32 = arith.constant 0 : i32
    %c0_i32_0 = arith.constant 0 : i32
    %c0_i32_1 = arith.constant 0 : i32
    return %c0_i32, %c0_i32_0 : i32, i32
  }
  func.func @transform_15(%arg0: i32) -> (i32, i32) {
    %c0_i32 = arith.constant 0 : i32
    %c0_i32_0 = arith.constant 0 : i32
    %c0_i32_1 = arith.constant 0 : i32
    return %c0_i32, %c0_i32_0 : i32, i32
  }
  func.func @transform_16(%arg0: i32) -> (i32, i32) {
    %c0_i32 = arith.constant 0 : i32
    %c0_i32_0 = arith.constant 0 : i32
    %c0_i32_1 = arith.constant 0 : i32
    return %c0_i32, %c0_i32_0 : i32, i32
  }
  func.func @transform_17(%arg0: i32) -> (i32, i32) {
    %c0_i32 = arith.constant 0 : i32
    %c0_i32_0 = arith.constant 0 : i32
    return %arg0, %c0_i32 : i32, i32
  }
}

</mosaic_0001>

<bundles_post_ra>
// kernel: tpu_custom_call.1
= control target key start
LH: loop header
LB: loop body
LE: loop exit
PB: predicated region body
PF: predicated region fallthrough
CT: control target
= control target key end

     0   :  { %s5006_s0 = inlined_call_operand.vmem [shape: f32[16,32], index: 0, kind: input, shape index: {}]   ;;  %s5007_s1 = inlined_call_operand.vmem [shape: f32[1,32], index: 1, kind: input, shape index: {}]   ;;  %s5008_s2 = inlined_call_operand.vmem [shape: f32[1,32], index: 2, kind: input, shape index: {}]   ;;  %s5009_s3 = inlined_call_operand.vmem [shape: bf16[32,32], index: 3, kind: input, shape index: {}]   ;;  %s5010_s4 = inlined_call_operand.vmem [shape: bf16[32,32], index: 4, kind: input, shape index: {}]   ;;  %s5011_s5 = inlined_call_operand.vmem [shape: bf16[32,32], index: 5, kind: input, shape index: {}]   ;;  %s5012_s6 = inlined_call_operand.hbm [shape: f32[1,32], index: 6, kind: input, shape index: {}]   ;;  %s5013_s7 = inlined_call_operand.hbm [shape: f32[1,32], index: 7, kind: input, shape index: {}]   ;;  %s5014_s8 = inlined_call_operand.hbm [shape: f32[1,32], index: 8, kind: input, shape index: {}]   ;;  %s5015_s9 = inlined_call_operand.vmem [shape: bf16[8,4,32], index: 9, kind: input, shape index: {}]   ;;  %s5016_s10 = inlined_call_operand.vmem [shape: f32[1,32], index: 10, kind: input, shape index: {}]   ;;  %s5017_s11 = inlined_call_operand.vmem [shape: f32[1,32], index: 11, kind: input, shape index: {}]   ;;  %s5018_s12 = inlined_call_operand.vmem [shape: f32[1,32], index: 12, kind: input, shape index: {}]   ;;  %s5019_s13 = inlined_call_operand.vmem [shape: bf16[32,128], index: 13, kind: input, shape index: {}]   ;;  %s5020_s14 = inlined_call_operand.vmem [shape: f32[1,128], index: 14, kind: input, shape index: {}]   ;;  %s5021_s15 = inlined_call_operand.vmem [shape: bf16[128,32], index: 15, kind: input, shape index: {}]   ;;  %s5022_s16 = inlined_call_operand.vmem [shape: f32[1,32], index: 16, kind: input, shape index: {}]   ;;  %s5023_s17 = inlined_call_operand.hbm [shape: f32[16,32], index: 17, kind: output, shape index: {}]  }
   0x1   :  { %5025 = sst [smem:[#allocation12_spill]] %s5006_s0 }
   0x2   :  { %5026 = sst [smem:[#allocation13_spill]] %s5007_s1 }
   0x3   :  { %22 = vsyncpa [#allocation3], 0 }
   0x4   :  { %23 = vsyncpa [#allocation6], 0 }
   0x5   :  { %24 = vsyncpa [#allocation4], 0  ;;  %s4310_s24 = smov [#allocation5]   ;;  %s4311_s26 = smov [#allocation2]  }
   0x6   :  { %s53_s25 = sshll.u32 %s4310_s24, 4  ;;  %s43_s27 = sshll.u32 %s4311_s26, 4  ;;  %s54_s25 = int_to_ptr.vmem [resolvable:$true] %s53_s25  ;;  %s44_s27 = int_to_ptr.vmem [resolvable:$true] %s43_s27 }
   0x7   :  { %s4216_s0 = scalar_lea.hbm %s5013_s7, 16 }
   0x8   :  { %p4217_p0 = scmp.ne.s32.totalorder %s5013_s7, %s4216_s0  ;;  %p4220_p1 = scmp.lt.u32.totalorder %s4216_s0, %s5013_s7 }
   0xa   :  { %p4222_p2 = pnand %p4220_p1, %p4217_p0 }
   0xc   :  { %4225 = shalt.err (!%p4222_p2)
}
   0xd   :  { %s4226_s20 = scalar_lea.vmem %s54_s25, 16  ;;  %s4230_s21 = scalar_lea.vmem %s54_s25, 32 }
   0xe   :  { %p4227_p3 = scmp.ne.s32.totalorder %s54_s25, %s4226_s20  ;;  %p4231_p4 = scmp.lt.s32.totalorder %s54_s25, %s54_s25 }
   0xf   :  { %p4232_p5 = scmp.lt.s32.totalorder %s4230_s21, %s4226_s20 }
  0x11   :  { %p4233_p6 = por %p4232_p5, %p4231_p4 }
  0x13   :  { %p4234_p7 = pnand %p4233_p6, %p4227_p3 }
  0x15   :  { %4237 = shalt.err (!%p4234_p7)
}
  0x16   :  { %56 = dma.hbm_to_vmem [thread:$0]  %s5013_s7, 16, %s54_s25, [#allocation6]  }
  0x17   :  { %s4238_s28 = scalar_lea.hbm %s5012_s6, 16 }
  0x18   :  { %p4239_p8 = scmp.ne.s32.totalorder %s5012_s6, %s4238_s28  ;;  %p4242_p9 = scmp.lt.u32.totalorder %s4238_s28, %s5012_s6 }
  0x1a   :  { %p4244_p10 = pnand %p4242_p9, %p4239_p8 }
  0x1c   :  { %4247 = shalt.err (!%p4244_p10)
}
  0x1d   :  { %s4248_s19 = scalar_lea.vmem %s44_s27, 16  ;;  %s4252_s1 = scalar_lea.vmem %s44_s27, 32 }
  0x1e   :  { %p4249_p11 = scmp.ne.s32.totalorder %s44_s27, %s4248_s19  ;;  %p4253_p12 = scmp.lt.s32.totalorder %s44_s27, %s44_s27 }
  0x1f   :  { %p4254_p13 = scmp.lt.s32.totalorder %s4252_s1, %s4248_s19 }
  0x21   :  { %p4255_p0 = por %p4254_p13, %p4253_p12 }
  0x23   :  { %p4256_p1 = pnand %p4255_p0, %p4249_p11 }
  0x25   :  { %4259 = shalt.err (!%p4256_p1)
}
  0x26   :  { %46 = dma.hbm_to_vmem [thread:$0]  %s5012_s6, 16, %s44_s27, [#allocation3]  }
  0x27   :  { %s4312_s20 = smov [#allocation7]   ;;  %s4260_s24 = scalar_lea.hbm %s5014_s8, 16 }
  0x28   :  { %s63_s21 = sshll.u32 %s4312_s20, 4  ;;  %p4261_p2 = scmp.ne.s32.totalorder %s5014_s8, %s4260_s24  ;;  %s64_s21 = int_to_ptr.vmem [resolvable:$true] %s63_s21 }
  0x29   :  { %p4264_p3 = scmp.lt.u32.totalorder %s4260_s24, %s5014_s8 }
  0x2b   :  { %p4266_p4 = pnand %p4264_p3, %p4261_p2 }
  0x2d   :  { %4269 = shalt.err (!%p4266_p4)
}
  0x2e   :  { %s4270_s30 = scalar_lea.vmem %s64_s21, 16  ;;  %s4274_s6 = scalar_lea.vmem %s64_s21, 32 }
  0x2f   :  { %p4271_p5 = scmp.ne.s32.totalorder %s64_s21, %s4270_s30  ;;  %p4275_p6 = scmp.lt.s32.totalorder %s64_s21, %s64_s21 }
  0x30   :  { %p4276_p7 = scmp.lt.s32.totalorder %s4274_s6, %s4270_s30 }
  0x32   :  { %p4277_p8 = por %p4276_p7, %p4275_p6 }
  0x34   :  { %p4278_p9 = pnand %p4277_p8, %p4271_p5 }
  0x36   :  { %4281 = shalt.err (!%p4278_p9)
}
  0x37   :  { %66 = dma.hbm_to_vmem [thread:$0]  %s5014_s8, 16, %s64_s21, [#allocation6]  }
  0x38   :  { %4304 = dma.done.wait [#allocation3], 16  }
  0x39   :  { %4305 = vsyncadd [#allocation3], 4294967280 }
  0x3a   :  { %4306 = dma.done.wait [#allocation6], 32  }
  0x3b   :  { %4307 = vsyncadd [#allocation6], 4294967264  ;;  %vm97_vm0 = vcmask 261120   ;;  %s5027_s7 = sld [smem:[#allocation12_spill]]  ;;  %v4124_v14 = vld [vmem:[%s5009_s3] sm:$0xff]   ;;  %v4313_v15 = vmov 0.0  }
  0x3c   :  { %3849 = vmatprep.subr.bf16.mxu1 %v4313_v15  ;;  %3873 = vmatprep.subr.mxu0 %v4313_v15  ;;  %v4125_v16 = vld [vmem:[%s5009_s3 + $0x8] sm:$0xff]   ;;  %vm4314_vm1 = vmmov 0   ;;  %s5028_s26 = sld [smem:[#allocation13_spill]]  ;;  %v3656_v29 = vld [vmem:[%s5008_s2] ss:$0 sm:$0xff]  ;;  %vm339_vm2 = vcmask 31744  }
  0x3d   :  { %3850 = vmatpush3.bf16.msra.mxu1 %v4124_v14  ;;  %3853 = vmatprep.mubr.msk.bf16.mxu1 %vm4314_vm1, %v4313_v15  ;;  %v4126_v33 = vld [vmem:[%s5010_s4] sm:$0xff]   ;;  %v4127_v35 = vld [vmem:[%s5010_s4 + $0x8] sm:$0xff]   ;;  %s4315_s4 = smov 124   ;;  %vm492_vm3 = vcmask 64512   ;;  %s4318_s25 = smov 112   ;;  %vm666_vm4 = vcmask 1041408  }
  0x3e   :  { %3851 = vmatprep.subr.bf16.mxu1 %v4313_v15  ;;  %3875 = vmatprep.mubr.msk.f32.mxu0 %vm4314_vm1, %v4313_v15  ;;  %v4128_v36 = vld [vmem:[%s5011_s5] sm:$0xff]   ;;  %v4129_v37 = vld [vmem:[%s5011_s5 + $0x8] sm:$0xff]   ;;  %s4316_s5 = smov 120   ;;  %s4319_s21 = smov 108  }
  0x3f   :  { %v3657_v38 = vld [vmem:[#allocation2] ss:$0 sm:$0xff]  ;;  %v3661_v45 = vld [vmem:[#allocation5] ss:$0 sm:$0xff]  ;;  %v3665_v54 = vld [vmem:[#allocation7] ss:$0 sm:$0xff] }
  0x40   :  { %s4321_s0 = smov 100  }
  0x41   :  { %v4454_v0 = vld [vmem:[%s5027_s7] sm:$0xff]  ;;  %v4459_v1 = vld [vmem:[%s5027_s7 + $0x8] sm:$0xff]  ;;  %3852 = vmatpush3.bf16.msra.mxu1 %v4125_v16  ;;  %s4317_s7 = smov 116  }
  0x42   :  { %v98_v2 = vsel %vm97_vm0, %v4454_v0, 0.0  ;;  %v101_v3 = vsel %vm97_vm0, %v4459_v1, 0.0  ;;  %3857 = vmatprep.subr.bf16.mxu1 %v4313_v15  ;;  %v3655_v25 = vld [vmem:[%s5028_s26] ss:$0 sm:$0xff]  ;;  %s4320_s26 = smov 104  }
  0x43   :  { %99 = vadd.xlane.f32.xlu0 %v98_v2 }
  0x47   :  { %102 = vadd.xlane.f32.xlu0 %v101_v3 }
  0xd0   :  { %v100_v4 = vpop.xlane.xlu0 %99 }
  0xd1   :  { %v105_v5 = vmul.f32 0.03125, %v100_v4 }
  0xd3   :  { %v107_v6 = vsub.f32 %v4454_v0, %v105_v5 }
  0xd4   :  { %v103_v7 = vpop.xlane.xlu0 %102 }
  0xd5   :  { %v106_v8 = vmul.f32 0.03125, %v103_v7  ;;  %v109_v9 = vmul.f32 %v107_v6, %v107_v6 }
  0xd7   :  { %v108_v10 = vsub.f32 %v4459_v1, %v106_v8  ;;  %v111_v11 = vsel %vm97_vm0, %v109_v9, 0.0 }
  0xd8   :  { %112 = vadd.xlane.f32.xlu1 %v111_v11 }
  0xd9   :  { %v110_v12 = vmul.f32 %v108_v10, %v108_v10 }
  0xdb   :  { %v114_v13 = vsel %vm97_vm0, %v110_v12, 0.0 }
  0xdc   :  { %115 = vadd.xlane.f32.xlu1 %v114_v13 }
 0x165   :  { %v113_v17 = vpop.xlane.xlu1 %112 }
 0x166   :  { %v117_v18 = vmul.f32 0.03125, %v113_v17 }
 0x168   :  { %v119_v19 = vadd.f32 1e-05, %v117_v18 }
 0x169   :  { %v116_v20 = vpop.xlane.xlu1 %115 }
 0x16a   :  { %4140 = vrsqrt.f32 %v119_v19  ;;  %v118_v21 = vmul.f32 0.03125, %v116_v20 }
 0x16c   :  { %v120_v22 = vadd.f32 1e-05, %v118_v21 }
 0x16e   :  { %4142 = vrsqrt.f32 %v120_v22 }
 0x174   :  { %v4141_v23 = vpop.eup %4140 }
 0x175   :  { %v123_v24 = vmul.f32 %v4141_v23, %v107_v6 }
 0x177   :  { %v131_v28 = vmul.f32 %v3655_v25, %v123_v24 }
 0x178   :  { %v4143_v26 = vpop.eup %4142 }
 0x179   :  { %v124_v27 = vmul.f32 %v4143_v26, %v108_v10  ;;  %v139_v31 = vadd.f32 %v3656_v29, %v131_v28 }
 0x17b   :  { %v132_v30 = vmul.f32 %v3655_v25, %v124_v27 }
 0x17d   :  { %v140_v32 = vadd.f32 %v3656_v29, %v132_v30 }
 0x17f   :  { %v141_v34 = vpack.c.bf16 %v140_v32, %v139_v31 }
 0x181   :  { %3854 = vmatmul.mubr.msk.bf16.vlgmr.msra.gmra.mrb[0].mxu1 %vm97_vm0, %v141_v34 }
 0x182   :  { %3858 = vmatpush3.bf16.msra.mxu1 %v4126_v33  ;;  %3861 = vmatprep.mubr.msk.bf16.mxu1 %vm4314_vm1, %v4313_v15 }
 0x183   :  { %3859 = vmatprep.subr.bf16.mxu1 %v4313_v15 }
 0x186   :  { %3860 = vmatpush3.bf16.msra.mxu1 %v4127_v35 }
 0x187   :  { %3865 = vmatprep.subr.bf16.mxu1 %v4313_v15 }
 0x189   :  { %3862 = vmatmul.mubr.msk.bf16.vlgmr.msra.gmra.mrb[4].mxu1 %vm97_vm0, %v141_v34 }
 0x18a   :  { %3866 = vmatpush3.bf16.msra.mxu1 %v4128_v36  ;;  %3869 = vmatprep.mubr.msk.bf16.mxu1 %vm4314_vm1, %v4313_v15 }
 0x18b   :  { %3867 = vmatprep.subr.bf16.mxu1 %v4313_v15 }
 0x18e   :  { %3868 = vmatpush3.bf16.msra.mxu1 %v4129_v37 }
 0x18f   :  { %3878 = vmatprep.subr.mxu1 %v4313_v15 }
 0x191   :  { %3870 = vmatmul.mubr.msk.bf16.vlgmr.msra.gmra.mrb[8].mxu1 %vm97_vm0, %v141_v34 }
 0x192   :  { %3880 = vmatprep.mubr.msk.f32.mxu1 %vm4314_vm1, %v4313_v15 }
 0x254   :  { %v202_v39 = vpop.f32.mrb[0].mxu1 }
 0x255   :  { %v203_v40 = vadd.f32 %v3657_v38, %v202_v39  ;;  %v3855_v41 = vpop.f32.mrb[1].mxu1 }
 0x256   :  { %v205_v42 = vpop.f32.mrb[2].mxu1 }
 0x257   :  { %v4514_v43 = vmul.f32 0.5, %v203_v40  ;;  %v3856_v44 = vpop.f32.mrb[3].mxu1  ;;  %v206_v49 = vadd.f32 %v3657_v38, %v205_v42 }
 0x259   :  { %713 = vrot.lane.b32.xlu1 %v4514_v43, %s4315_s4  ;;  %v4529_v53 = vmul.f32 0.5, %v206_v49 }
 0x25c   :  { %v266_v46 = vpop.f32.mrb[4].mxu1 }
 0x25d   :  { %v4518_v47 = vadd.f32 %v3661_v45, %v266_v46  ;;  %v3863_v48 = vpop.f32.mrb[5].mxu1 }
 0x25e   :  { %v269_v50 = vpop.f32.mrb[6].mxu1 }
 0x25f   :  { %v4520_v51 = vadd.f32 %v3661_v45, %v269_v50  ;;  %v3864_v52 = vpop.f32.mrb[7].mxu1  ;;  %3874 = vmatpush3.xpose.msk.msra.mxu0 %vm339_vm2, %v4518_v47 }
 0x260   :  { %3883 = vmatprep.subr.mxu0 %v4313_v15 }
 0x261   :  { %793 = vrot.lane.b32.xlu1 %v4520_v51, %s4315_s4  ;;  %3879 = vmatpush3.xpose.msk.msra.mxu1 %vm339_vm2, %v4520_v51 }
 0x262   :  { %3876 = vmatmul.mubr.msk.f32.vlgmr.msra.gmra.mrb[0].mxu0 %vm339_vm2, %v4514_v43  ;;  %3888 = vmatprep.subr.mxu1 %v4313_v15 }
 0x263   :  { %3885 = vmatprep.mubr.msk.f32.mxu0 %vm4314_vm1, %v4313_v15 }
 0x264   :  { %v330_v55 = vpop.f32.mrb[8].mxu1  ;;  %3881 = vmatmul.mubr.msk.f32.vlgmr.msra.gmra.mrb[12].mxu1 %vm339_vm2, %v4529_v53 }
 0x265   :  { %v4538_v56 = vadd.f32 %v3665_v54, %v330_v55  ;;  %v3871_v57 = vpop.f32.mrb[9].mxu1  ;;  %3890 = vmatprep.mubr.msk.f32.mxu1 %vm4314_vm1, %v4313_v15 }
 0x266   :  { %v333_v58 = vpop.f32.mrb[10].mxu1 }
 0x267   :  { %v4542_v59 = vadd.f32 %v3665_v54, %v333_v58  ;;  %v3872_v60 = vpop.f32.mrb[11].mxu1  ;;  %3884 = vmatpush3.msra.mxu0 %v4538_v56 }
 0x268   :  { %3893 = vmatprep.subr.bf16.mxu0 %v4313_v15 }
 0x269   :  { %3889 = vmatpush3.msra.mxu1 %v4542_v59 }
 0x26a   :  { %3899 = vmatprep.subr.mxu1 %v4313_v15 }
 0x2cb   :  { %v714_v9 = vpop.permute.xlu1 %713 }
 0x2d3   :  { %v794_v10 = vpop.permute.xlu1 %793 }
 0x335   :  { %v4548_v61 = vpop.f32.mrb[0].mxu0 }
 0x336   :  { %v3877_v62 = vpop.f32.mrb[1].mxu0  ;;  %v493_v45 = vsel %vm492_vm3, %v4548_v61, -inf }
 0x337   :  { %v488_v63 = vpop.f32.mrb[12].mxu1 }
 0x338   :  { %v3882_v2 = vpop.f32.mrb[13].mxu1  ;;  %v496_v3 = vsel %vm492_vm3, %v488_v63, -inf }
 0x339   :  { %497 = vmax.xlane.f32.xlu0 %v496_v3 }
 0x34f   :  { %715 = vrot.lane.b32.xlu0 %v4518_v47, %s4315_s4 }
 0x3c6   :  { %v498_v4 = vpop.xlane.xlu0 %497 }
 0x3c7   :  { %v500_v5 = vsub.f32 %v488_v63, %v498_v4 }
 0x3c9   :  { %v503_v6 = vmul.f32 1.442695, %v500_v5 }
 0x3ca   :  { %v716_v14 = vpop.permute.xlu0 %715 }
 0x3cb   :  { %4144 = vpow2.f32 %v503_v6 }
 0x3d5   :  { %v4145_v7 = vpop.eup %4144 }
 0x3d6   :  { %v508_v8 = vsel %vm492_vm3, %v4145_v7, 0.0 }
 0x3d7   :  { %509 = vadd.xlane.f32.xlu1 %v508_v8 }
 0x3e8   :  { %791 = vrot.lane.b32.xlu1 %v4529_v53, %s4315_s4 }
 0x3ec   :  { %1099 = vrot.lane.b32.xlu1 %v4518_v47, %s4316_s5 }
 0x464   :  { %v510_v11 = vpop.xlane.xlu1 %509 }
 0x465   :  { %4146 = vrcp.f32 %v510_v11  ;;  %v662_v11 = vld [vmem:[%s5015_s9] sm:$0x3] }
 0x468   :  { %v792_v16 = vpop.permute.xlu1 %791 }
 0x46c   :  { %v1100_v30 = vpop.permute.xlu1 %1099 }
 0x46f   :  { %v4147_v12 = vpop.eup %4146 }
 0x470   :  { %v514_v13 = vmul.f32 %v4147_v12, %v4145_v7  ;;  %v668_v12 = vsel %vm666_vm4, %v662_v11, 0 }
 0x472   :  { %3891 = vmatmul.mubr.msk.f32.vlgmr.msra.gmra.mrb[14].mxu1 %vm492_vm3, %v514_v13 }
 0x473   :  { %3900 = vmatpush3.xpose.msk.msra.mxu1 %vm339_vm2, %v716_v14  ;;  %3901 = vmatprep.mubr.msk.f32.mxu1 %vm4314_vm1, %v4313_v15 }
 0x474   :  { %3904 = vmatprep.subr.mxu1 %v4313_v15 }
 0x476   :  { %3902 = vmatmul.mubr.msk.f32.vlgmr.msra.gmra.mrb[16].mxu1 %vm339_vm2, %v714_v9 }
 0x477   :  { %3905 = vmatpush3.xpose.msk.msra.mxu1 %vm339_vm2, %v794_v10  ;;  %3906 = vmatprep.mubr.msk.f32.mxu1 %vm4314_vm1, %v4313_v15 }
 0x478   :  { %3914 = vmatprep.subr.mxu1 %v4313_v15 }
 0x47a   :  { %3907 = vmatmul.mubr.msk.f32.vlgmr.msra.gmra.mrb[18].mxu1 %vm339_vm2, %v792_v16 }
 0x47b   :  { %3916 = vmatprep.mubr.msk.f32.mxu1 %vm4314_vm1, %v4313_v15 }
 0x545   :  { %v4571_v17 = vpop.f32.mrb[14].mxu1 }
 0x546   :  { %v3892_v18 = vpop.f32.mrb[15].mxu1 }
 0x549   :  { %v4573_v19 = vpop.f32.mrb[16].mxu1 }
 0x54a   :  { %v3903_v20 = vpop.f32.mrb[17].mxu1  ;;  %v869_v3 = vsel %vm492_vm3, %v4573_v19, -inf }
 0x54d   :  { %v865_v21 = vpop.f32.mrb[18].mxu1 }
 0x54e   :  { %v3908_v22 = vpop.f32.mrb[19].mxu1  ;;  %v872_v23 = vsel %vm492_vm3, %v865_v21, -inf }
 0x54f   :  { %873 = vmax.xlane.f32.xlu0 %v872_v23 }
 0x565   :  { %969 = vrot.lane.b32.xlu0 %v4542_v59, %s4315_s4 }
 0x569   :  { %1097 = vrot.lane.b32.xlu0 %v4514_v43, %s4316_s5 }
 0x56d   :  { %1175 = vrot.lane.b32.xlu0 %v4529_v53, %s4316_s5 }
 0x5dc   :  { %v874_v24 = vpop.xlane.xlu0 %873 }
 0x5dd   :  { %v876_v25 = vsub.f32 %v865_v21, %v874_v24 }
 0x5df   :  { %v879_v26 = vmul.f32 1.442695, %v876_v25 }
 0x5e0   :  { %v970_v27 = vpop.permute.xlu0 %969 }
 0x5e1   :  { %4148 = vpow2.f32 %v879_v26  ;;  %3915 = vmatpush3.msra.mxu1 %v970_v27 }
 0x5e2   :  { %3925 = vmatprep.subr.mxu1 %v4313_v15 }
 0x5e4   :  { %v1098_v34 = vpop.permute.xlu0 %1097 }
 0x5e8   :  { %v1176_v36 = vpop.permute.xlu0 %1175 }
 0x5eb   :  { %v4149_v28 = vpop.eup %4148 }
 0x5ec   :  { %v884_v29 = vsel %vm492_vm3, %v4149_v28, 0.0 }
 0x5ed   :  { %885 = vadd.xlane.f32.xlu1 %v884_v29 }
 0x5fe   :  { %1177 = vrot.lane.b32.xlu1 %v4520_v51, %s4316_s5 }
 0x67a   :  { %v886_v31 = vpop.xlane.xlu1 %885 }
 0x67b   :  { %4150 = vrcp.f32 %v886_v31 }
 0x67e   :  { %v1178_v35 = vpop.permute.xlu1 %1177 }
 0x685   :  { %v4151_v32 = vpop.eup %4150 }
 0x686   :  { %v890_v33 = vmul.f32 %v4151_v32, %v4149_v28 }
 0x688   :  { %3917 = vmatmul.mubr.msk.f32.vlgmr.msra.gmra.mrb[20].mxu1 %vm492_vm3, %v890_v33 }
 0x689   :  { %3926 = vmatpush3.xpose.msk.msra.mxu1 %vm339_vm2, %v1100_v30  ;;  %3927 = vmatprep.mubr.msk.f32.mxu1 %vm4314_vm1, %v4313_v15 }
 0x68a   :  { %3930 = vmatprep.subr.mxu1 %v4313_v15 }
 0x68c   :  { %3928 = vmatmul.mubr.msk.f32.vlgmr.msra.gmra.mrb[22].mxu1 %vm339_vm2, %v1098_v34 }
 0x68d   :  { %3931 = vmatpush3.xpose.msk.msra.mxu1 %vm339_vm2, %v1178_v35  ;;  %3932 = vmatprep.mubr.msk.f32.mxu1 %vm4314_vm1, %v4313_v15 }
 0x68e   :  { %3940 = vmatprep.subr.mxu1 %v4313_v15 }
 0x690   :  { %3933 = vmatmul.mubr.msk.f32.vlgmr.msra.gmra.mrb[24].mxu1 %vm339_vm2, %v1176_v36 }
 0x691   :  { %3942 = vmatprep.mubr.msk.f32.mxu1 %vm4314_vm1, %v4313_v15 }
 0x75b   :  { %v4599_v37 = vpop.f32.mrb[20].mxu1 }
 0x75c   :  { %v3918_v38 = vpop.f32.mrb[21].mxu1 }
 0x75f   :  { %v4601_v39 = vpop.f32.mrb[22].mxu1 }
 0x760   :  { %v3929_v40 = vpop.f32.mrb[23].mxu1 }
 0x763   :  { %v1249_v41 = vpop.f32.mrb[24].mxu1 }
 0x764   :  { %v3934_v42 = vpop.f32.mrb[25].mxu1  ;;  %v1256_v44 = vsel %vm492_vm3, %v1249_v41, -inf }
 0x765   :  { %1257 = vmax.xlane.f32.xlu1 %v1256_v44 }
 0x776   :  { %1481 = vrot.lane.b32.xlu1 %v4518_v47, %s4317_s7 }
 0x77a   :  { %1479 = vrot.lane.b32.xlu1 %v4514_v43, %s4317_s7 }
 0x77e   :  { %1557 = vrot.lane.b32.xlu1 %v4529_v53, %s4317_s7 }
 0x7a2   :  { %494 = vmax.xlane.f32.xlu1 %v493_v45 }
 0x7f2   :  { %v1258_v46 = vpop.xlane.xlu1 %1257 }
 0x7f3   :  { %v1260_v48 = vsub.f32 %v1249_v41, %v1258_v46 }
 0x7f5   :  { %v1263_v49 = vmul.f32 1.442695, %v1260_v48 }
 0x7f6   :  { %v1482_v54 = vpop.permute.xlu1 %1481 }
 0x7f7   :  { %4152 = vpow2.f32 %v1263_v49 }
 0x7fa   :  { %v1480_v55 = vpop.permute.xlu1 %1479 }
 0x7fe   :  { %v1558_v57 = vpop.permute.xlu1 %1557 }
 0x801   :  { %v4153_v50 = vpop.eup %4152 }
 0x802   :  { %v1268_v52 = vsel %vm492_vm3, %v4153_v50, 0.0 }
 0x803   :  { %1269 = vadd.xlane.f32.xlu0 %v1268_v52 }
 0x819   :  { %1351 = vrot.lane.b32.xlu0 %v4542_v59, %s4316_s5 }
 0x81d   :  { %1559 = vrot.lane.b32.xlu0 %v4520_v51, %s4317_s7 }
 0x82f   :  { %v495_v58 = vpop.xlane.xlu1 %494 }
 0x830   :  { %v499_v60 = vsub.f32 %v4548_v61, %v495_v58 }
 0x832   :  { %v501_v62 = vmul.f32 1.442695, %v499_v60 }
 0x834   :  { %4154 = vpow2.f32 %v501_v62 }
 0x83e   :  { %v4155_v63 = vpop.eup %4154 }
 0x83f   :  { %v505_v2 = vsel %vm492_vm3, %v4155_v63, 0.0 }
 0x840   :  { %506 = vadd.xlane.f32.xlu1 %v505_v2 }
 0x851   :  { %1863 = vrot.lane.b32.xlu1 %v4518_v47, %s4318_s25 }
 0x855   :  { %1941 = vrot.lane.b32.xlu1 %v4520_v51, %s4318_s25 }
 0x879   :  { %870 = vmax.xlane.f32.xlu1 %v869_v3 }
 0x890   :  { %v1270_v4 = vpop.xlane.xlu0 %1269 }
 0x891   :  { %4156 = vrcp.f32 %v1270_v4 }
 0x894   :  { %v1352_v61 = vpop.permute.xlu0 %1351 }
 0x895   :  { %3941 = vmatpush3.msra.mxu1 %v1352_v61 }
 0x896   :  { %3951 = vmatprep.subr.mxu1 %v4313_v15 }
 0x898   :  { %v1560_v7 = vpop.permute.xlu0 %1559 }
 0x89b   :  { %v4157_v5 = vpop.eup %4156 }
 0x89c   :  { %v1274_v6 = vmul.f32 %v4157_v5, %v4153_v50  ;;  %v1253_v5 = vsel %vm492_vm3, %v4601_v39, -inf }
 0x89e   :  { %3943 = vmatmul.mubr.msk.f32.vlgmr.msra.gmra.mrb[26].mxu1 %vm492_vm3, %v1274_v6 }
 0x89f   :  { %3952 = vmatpush3.xpose.msk.msra.mxu1 %vm339_vm2, %v1482_v54  ;;  %3953 = vmatprep.mubr.msk.f32.mxu1 %vm4314_vm1, %v4313_v15 }
 0x8a0   :  { %3956 = vmatprep.subr.mxu1 %v4313_v15 }
 0x8a2   :  { %3954 = vmatmul.mubr.msk.f32.vlgmr.msra.gmra.mrb[28].mxu1 %vm339_vm2, %v1480_v55 }
 0x8a3   :  { %3957 = vmatpush3.xpose.msk.msra.mxu1 %vm339_vm2, %v1560_v7  ;;  %3958 = vmatprep.mubr.msk.f32.mxu1 %vm4314_vm1, %v4313_v15 }
 0x8a4   :  { %3966 = vmatprep.subr.mxu1 %v4313_v15 }
 0x8a6   :  { %3959 = vmatmul.mubr.msk.f32.vlgmr.msra.gmra.mrb[30].mxu1 %vm339_vm2, %v1558_v57  ;;  %v3682_v57 = vld [vmem:[%s5015_s9 + $0x2] sm:$0x3] }
 0x8a7   :  { %3968 = vmatprep.mubr.msk.f32.mxu1 %vm4314_vm1, %v4313_v15  ;;  %v1052_v58 = vsel %vm666_vm4, %v3682_v57, 0 }
 0x8cd   :  { %v507_v8 = vpop.xlane.xlu1 %506 }
 0x8ce   :  { %4158 = vrcp.f32 %v507_v8 }
 0x8d1   :  { %v1864_v32 = vpop.permute.xlu1 %1863 }
 0x8d8   :  { %v4159_v9 = vpop.eup %4158 }
 0x8d9   :  { %v513_v10 = vmul.f32 %v4159_v9, %v4155_v63 }
 0x8db   :  { %3886 = vmatmul.mubr.msk.f32.vlgmr.msra.gmra.mrb[2].mxu0 %vm492_vm3, %v513_v10 }
 0x8dc   :  { %3895 = vmatprep.mubr.msk.bf16.mxu0 %vm4314_vm1, %v4313_v15  ;;  %3894 = vmatpush3.bf16.msra.mxu0 %v668_v12 }
 0x8dd   :  { %3909 = vmatprep.subr.mxu0 %v4313_v15 }
 0x971   :  { %v4647_v13 = vpop.f32.mrb[26].mxu1 }
 0x972   :  { %v3944_v14 = vpop.f32.mrb[27].mxu1 }
 0x975   :  { %v4649_v16 = vpop.f32.mrb[28].mxu1 }
 0x976   :  { %v3955_v18 = vpop.f32.mrb[29].mxu1 }
 0x979   :  { %v1631_v20 = vpop.f32.mrb[30].mxu1 }
 0x97a   :  { %v3960_v21 = vpop.f32.mrb[31].mxu1  ;;  %v1638_v22 = vsel %vm492_vm3, %v1631_v20, -inf }
 0x97b   :  { %1639 = vmax.xlane.f32.xlu0 %v1638_v22 }
 0x991   :  { %1733 = vrot.lane.b32.xlu0 %v4542_v59, %s4317_s7 }
 0x9ae   :  { %v584_v23 = vpop.f32.mrb[2].mxu0 }
 0x9af   :  { %v661_v24 = vpack.c.bf16 %v4571_v17, %v584_v23  ;;  %v3887_v25 = vpop.f32.mrb[3].mxu0  ;;  %v1942_v17 = vpop.permute.xlu1 %1941 }
 0x9b1   :  { %3896 = vmatmul.mubr.msk.bf16.vlgmr.msra.gmra.mrb[4].mxu0 %vm339_vm2, %v661_v24 }
 0x9b2   :  { %3911 = vmatprep.mubr.msk.f32.mxu0 %vm4314_vm1, %v4313_v15 }
 0x9b3   :  { %v871_v33 = vpop.xlane.xlu1 %870 }
 0x9b4   :  { %v875_v34 = vsub.f32 %v4573_v19, %v871_v33 }
 0x9b6   :  { %v877_v35 = vmul.f32 1.442695, %v875_v34 }
 0xa08   :  { %v1640_v26 = vpop.xlane.xlu0 %1639 }
 0xa09   :  { %v1642_v27 = vsub.f32 %v1631_v20, %v1640_v26 }
 0xa0b   :  { %v1645_v28 = vmul.f32 1.442695, %v1642_v27 }
 0xa0c   :  { %v1734_v29 = vpop.permute.xlu0 %1733 }
 0xa0d   :  { %4160 = vpow2.f32 %v1645_v28  ;;  %3967 = vmatpush3.msra.mxu1 %v1734_v29 }
 0xa0e   :  { %3977 = vmatprep.subr.mxu1 %v4313_v15  ;;  %4162 = vpow2.f32 %v877_v35 }
 0xa17   :  { %v4161_v30 = vpop.eup %4160 }
 0xa18   :  { %v1650_v31 = vsel %vm492_vm3, %v4161_v30, 0.0  ;;  %v4163_v36 = vpop.eup %4162 }
 0xa19   :  { %1651 = vadd.xlane.f32.xlu0 %v1650_v31  ;;  %v881_v38 = vsel %vm492_vm3, %v4163_v36, 0.0 }
 0xa2f   :  { %1861 = vrot.lane.b32.xlu0 %v4514_v43, %s4318_s25 }
 0xa33   :  { %1939 = vrot.lane.b32.xlu0 %v4529_v53, %s4318_s25 }
 0xa52   :  { %882 = vadd.xlane.f32.xlu0 %v881_v38 }
 0xa68   :  { %892 = vrot.lane.b32.xlu0 %v4538_v56, %s4315_s4 }
 0xa6c   :  { %2245 = vrot.lane.b32.xlu0 %v4518_v47, %s4319_s21 }
 0xa70   :  { %2243 = vrot.lane.b32.xlu0 %v4514_v43, %s4319_s21 }
 0xa74   :  { %2323 = vrot.lane.b32.xlu0 %v4520_v51, %s4319_s21 }
 0xa84   :  { %v4674_v19 = vpop.f32.mrb[4].mxu0 }
 0xa85   :  { %v3897_v40 = vpop.f32.mrb[5].mxu0  ;;  %v711_v24 = vadd.f32 %v4674_v19, %v4454_v0 }
 0xa86   :  { %v4676_v41 = vpop.f32.mrb[6].mxu0 }
 0xa87   :  { %v3898_v42 = vpop.f32.mrb[7].mxu0  ;;  %v712_v26 = vadd.f32 %v4676_v41, %v4459_v1 }
 0xaa6   :  { %v1652_v44 = vpop.xlane.xlu0 %1651 }
 0xaa7   :  { %4164 = vrcp.f32 %v1652_v44 }
 0xaaa   :  { %v1862_v48 = vpop.permute.xlu0 %1861 }
 0xaae   :  { %v1940_v49 = vpop.permute.xlu0 %1939 }
 0xab1   :  { %v4165_v45 = vpop.eup %4164 }
 0xab2   :  { %v1656_v46 = vmul.f32 %v4165_v45, %v4161_v30 }
 0xab4   :  { %3969 = vmatmul.mubr.msk.f32.vlgmr.msra.gmra.mrb[32].mxu1 %vm492_vm3, %v1656_v46 }
 0xab5   :  { %3978 = vmatpush3.xpose.msk.msra.mxu1 %vm339_vm2, %v1864_v32  ;;  %3979 = vmatprep.mubr.msk.f32.mxu1 %vm4314_vm1, %v4313_v15 }
 0xab6   :  { %3982 = vmatprep.subr.mxu1 %v4313_v15 }
 0xab8   :  { %3980 = vmatmul.mubr.msk.f32.vlgmr.msra.gmra.mrb[34].mxu1 %vm339_vm2, %v1862_v48 }
 0xab9   :  { %3983 = vmatpush3.xpose.msk.msra.mxu1 %vm339_vm2, %v1942_v17  ;;  %3984 = vmatprep.mubr.msk.f32.mxu1 %vm4314_vm1, %v4313_v15 }
 0xaba   :  { %3992 = vmatprep.subr.mxu1 %v4313_v15 }
 0xabc   :  { %3985 = vmatmul.mubr.msk.f32.vlgmr.msra.gmra.mrb[36].mxu1 %vm339_vm2, %v1940_v49  ;;  %v3690_v49 = vld [vmem:[%s5015_s9 + $0x4] sm:$0x3] }
 0xabd   :  { %3994 = vmatprep.mubr.msk.f32.mxu1 %vm4314_vm1, %v4313_v15 }
 0xadf   :  { %v883_v50 = vpop.xlane.xlu0 %882 }
 0xae0   :  { %4166 = vrcp.f32 %v883_v50  ;;  %v1434_v50 = vsel %vm666_vm4, %v3690_v49, 0 }
 0xae3   :  { %v893_v52 = vpop.permute.xlu0 %892 }
 0xae4   :  { %3910 = vmatpush3.msra.mxu0 %v893_v52 }
 0xae5   :  { %3919 = vmatprep.subr.bf16.mxu0 %v4313_v15 }
 0xae7   :  { %v2246_v32 = vpop.permute.xlu0 %2245 }
 0xaea   :  { %v4167_v54 = vpop.eup %4166 }
 0xaeb   :  { %v889_v55 = vmul.f32 %v4167_v54, %v4163_v36  ;;  %v2244_v17 = vpop.permute.xlu0 %2243 }
 0xaed   :  { %3912 = vmatmul.mubr.msk.f32.vlgmr.msra.gmra.mrb[8].mxu0 %vm492_vm3, %v889_v55 }
 0xaee   :  { %3921 = vmatprep.mubr.msk.bf16.mxu0 %vm4314_vm1, %v4313_v15  ;;  %3920 = vmatpush3.bf16.msra.mxu0 %v1052_v58 }
 0xaef   :  { %3935 = vmatprep.subr.mxu0 %v4313_v15  ;;  %v2324_v33 = vpop.permute.xlu0 %2323 }
 0xb87   :  { %v4700_v60 = vpop.f32.mrb[32].mxu1 }
 0xb88   :  { %v3970_v62 = vpop.f32.mrb[33].mxu1 }
 0xb8b   :  { %v4702_v63 = vpop.f32.mrb[34].mxu1 }
 0xb8c   :  { %v3981_v2 = vpop.f32.mrb[35].mxu1 }
 0xb8f   :  { %v2013_v3 = vpop.f32.mrb[36].mxu1 }
 0xb90   :  { %v3986_v4 = vpop.f32.mrb[37].mxu1  ;;  %v2020_v61 = vsel %vm492_vm3, %v2013_v3, -inf }
 0xb91   :  { %2021 = vmax.xlane.f32.xlu1 %v2020_v61 }
 0xb95   :  { %1254 = vmax.xlane.f32.xlu1 %v1253_v5 }
 0xba6   :  { %2115 = vrot.lane.b32.xlu1 %v4542_v59, %s4318_s25 }
 0xbc0   :  { %v964_v6 = vpop.f32.mrb[8].mxu0 }
 0xbc1   :  { %v1045_v7 = vpack.c.bf16 %v4599_v37, %v964_v6  ;;  %v3913_v8 = vpop.f32.mrb[9].mxu0 }
 0xbc3   :  { %3922 = vmatmul.mubr.msk.bf16.vlgmr.msra.gmra.mrb[12].mxu0 %vm339_vm2, %v1045_v7 }
 0xbc4   :  { %3937 = vmatprep.mubr.msk.f32.mxu0 %vm4314_vm1, %v4313_v15 }
 0xc1e   :  { %v2022_v9 = vpop.xlane.xlu1 %2021 }
 0xc1f   :  { %v2024_v10 = vsub.f32 %v2013_v3, %v2022_v9 }
 0xc21   :  { %v2027_v11 = vmul.f32 1.442695, %v2024_v10 }
 0xc22   :  { %v1255_v12 = vpop.xlane.xlu1 %1254 }
 0xc23   :  { %4168 = vpow2.f32 %v2027_v11  ;;  %v1259_v14 = vsub.f32 %v4601_v39, %v1255_v12  ;;  %v1635_v39 = vsel %vm492_vm3, %v4649_v16, -inf }
 0xc25   :  { %v1261_v18 = vmul.f32 1.442695, %v1259_v14 }
 0xc26   :  { %v2116_v20 = vpop.permute.xlu1 %2115 }
 0xc27   :  { %4170 = vpow2.f32 %v1261_v18  ;;  %3993 = vmatpush3.msra.mxu1 %v2116_v20 }
 0xc28   :  { %4003 = vmatprep.subr.mxu1 %v4313_v15 }
 0xc2d   :  { %v4169_v37 = vpop.eup %4168 }
 0xc2e   :  { %v2032_v21 = vsel %vm492_vm3, %v4169_v37, 0.0 }
 0xc2f   :  { %2033 = vadd.xlane.f32.xlu1 %v2032_v21 }
 0xc31   :  { %v4171_v22 = vpop.eup %4170 }
 0xc32   :  { %v1265_v23 = vsel %vm492_vm3, %v4171_v22, 0.0 }
 0xc33   :  { %1266 = vadd.xlane.f32.xlu0 %v1265_v23 }
 0xc40   :  { %2321 = vrot.lane.b32.xlu1 %v4529_v53, %s4319_s21 }
 0xc44   :  { %1275 = vrot.lane.b32.xlu1 %v4538_v56, %s4316_s5 }
 0xc68   :  { %1636 = vmax.xlane.f32.xlu1 %v1635_v39  ;;  %v3698_v39 = vld [vmem:[%s5015_s9 + $0x6] sm:$0x3] }
 0xc79   :  { %2497 = vrot.lane.b32.xlu1 %v4542_v59, %s4319_s21 }
 0xc96   :  { %v1088_v25 = vpop.f32.mrb[12].mxu0 }
 0xc97   :  { %v4729_v27 = vadd.f32 %v1088_v25, %v711_v24  ;;  %v3923_v28 = vpop.f32.mrb[13].mxu0  ;;  %v1816_v24 = vsel %vm666_vm4, %v3698_v39, 0 }
 0xc98   :  { %v1091_v29 = vpop.f32.mrb[14].mxu0 }
 0xc99   :  { %v4731_v30 = vadd.f32 %v1091_v29, %v712_v26  ;;  %v3924_v31 = vpop.f32.mrb[15].mxu0 }
 0xcbc   :  { %v2034_v34 = vpop.xlane.xlu1 %2033 }
 0xcbd   :  { %4172 = vrcp.f32 %v2034_v34 }
 0xcc0   :  { %v1267_v35 = vpop.xlane.xlu0 %1266  ;;  %v2322_v36 = vpop.permute.xlu1 %2321 }
 0xcc1   :  { %4174 = vrcp.f32 %v1267_v35 }
 0xcc4   :  { %v1276_v0 = vpop.permute.xlu1 %1275 }
 0xcc5   :  { %3936 = vmatpush3.msra.mxu0 %v1276_v0 }
 0xcc6   :  { %3945 = vmatprep.subr.bf16.mxu0 %v4313_v15 }
 0xcc7   :  { %v4173_v1 = vpop.eup %4172 }
 0xcc8   :  { %v2038_v38 = vmul.f32 %v4173_v1, %v4169_v37  ;;  %v2017_v37 = vsel %vm492_vm3, %v4702_v63, -inf }
 0xcca   :  { %3995 = vmatmul.mubr.msk.f32.vlgmr.msra.gmra.mrb[38].mxu1 %vm492_vm3, %v2038_v38 }
 0xccb   :  { %v4175_v19 = vpop.eup %4174  ;;  %4004 = vmatpush3.xpose.msk.msra.mxu1 %vm339_vm2, %v2246_v32  ;;  %4005 = vmatprep.mubr.msk.f32.mxu1 %vm4314_vm1, %v4313_v15 }
 0xccc   :  { %v1273_v40 = vmul.f32 %v4175_v19, %v4171_v22  ;;  %4008 = vmatprep.subr.mxu1 %v4313_v15 }
 0xcce   :  { %3938 = vmatmul.mubr.msk.f32.vlgmr.msra.gmra.mrb[10].mxu0 %vm492_vm3, %v1273_v40  ;;  %4006 = vmatmul.mubr.msk.f32.vlgmr.msra.gmra.mrb[40].mxu1 %vm339_vm2, %v2244_v17 }
 0xccf   :  { %4009 = vmatpush3.xpose.msk.msra.mxu1 %vm339_vm2, %v2324_v33  ;;  %4010 = vmatprep.mubr.msk.f32.mxu1 %vm4314_vm1, %v4313_v15 }
 0xcd0   :  { %4018 = vmatprep.subr.mxu1 %v4313_v15  ;;  %3947 = vmatprep.mubr.msk.bf16.mxu0 %vm4314_vm1, %v4313_v15 }
 0xcd1   :  { %3946 = vmatpush3.bf16.msra.mxu0 %v1434_v50 }
 0xcd2   :  { %4011 = vmatmul.mubr.msk.f32.vlgmr.msra.gmra.mrb[42].mxu1 %vm339_vm2, %v2322_v36  ;;  %3961 = vmatprep.subr.mxu0 %v4313_v15 }
 0xcd3   :  { %4020 = vmatprep.mubr.msk.f32.mxu1 %vm4314_vm1, %v4313_v15 }
 0xcf5   :  { %v1637_v41 = vpop.xlane.xlu1 %1636 }
 0xcf6   :  { %v1641_v42 = vsub.f32 %v4649_v16, %v1637_v41 }
 0xcf8   :  { %v1643_v44 = vmul.f32 1.442695, %v1641_v42 }
 0xcf9   :  { %v2498_v45 = vpop.permute.xlu1 %2497 }
 0xcfa   :  { %4176 = vpow2.f32 %v1643_v44  ;;  %4019 = vmatpush3.msra.mxu1 %v2498_v45 }
 0xcfb   :  { %4029 = vmatprep.subr.mxu1 %v4313_v15 }
 0xd04   :  { %v4177_v46 = vpop.eup %4176 }
 0xd05   :  { %v1647_v48 = vsel %vm492_vm3, %v4177_v46, 0.0 }
 0xd06   :  { %1648 = vadd.xlane.f32.xlu0 %v1647_v48 }
 0xd9d   :  { %v4758_v16 = vpop.f32.mrb[38].mxu1 }
 0xd9e   :  { %v3996_v52 = vpop.f32.mrb[39].mxu1 }
 0xda1   :  { %v1347_v54 = vpop.f32.mrb[10].mxu0  ;;  %v4760_v55 = vpop.f32.mrb[40].mxu1 }
 0xda2   :  { %v1427_v57 = vpack.c.bf16 %v4647_v13, %v1347_v54  ;;  %v3939_v58 = vpop.f32.mrb[11].mxu0  ;;  %v4007_v62 = vpop.f32.mrb[41].mxu1  ;;  %v2399_v23 = vsel %vm492_vm3, %v4760_v55, -inf }
 0xda3   :  { %v1649_v13 = vpop.xlane.xlu0 %1648 }
 0xda4   :  { %3948 = vmatmul.mubr.msk.bf16.vlgmr.msra.gmra.mrb[16].mxu0 %vm339_vm2, %v1427_v57  ;;  %4178 = vrcp.f32 %v1649_v13 }
 0xda5   :  { %v2395_v2 = vpop.f32.mrb[42].mxu1  ;;  %3963 = vmatprep.mubr.msk.f32.mxu0 %vm4314_vm1, %v4313_v15 }
 0xda6   :  { %v4012_v3 = vpop.f32.mrb[43].mxu1  ;;  %v2402_v4 = vsel %vm492_vm3, %v2395_v2, -inf }
 0xda7   :  { %2403 = vmax.xlane.f32.xlu0 %v2402_v4 }
 0xdae   :  { %v4179_v5 = vpop.eup %4178 }
 0xdaf   :  { %v1655_v8 = vmul.f32 %v4179_v5, %v4177_v46 }
 0xdbd   :  { %1657 = vrot.lane.b32.xlu0 %v4538_v56, %s4317_s7  ;;  %s4322_s7 = smov [#allocation8]  }
 0xdc1   :  { %2627 = vrot.lane.b32.xlu0 %v4518_v47, %s4320_s26 }
 0xdc5   :  { %2705 = vrot.lane.b32.xlu0 %v4520_v51, %s4320_s26 }
 0xdc9   :  { %2703 = vrot.lane.b32.xlu0 %v4529_v53, %s4320_s26 }
 0xe34   :  { %v2404_v61 = vpop.xlane.xlu0 %2403 }
 0xe35   :  { %v2406_v6 = vsub.f32 %v2395_v2, %v2404_v61 }
 0xe37   :  { %v2409_v7 = vmul.f32 1.442695, %v2406_v6 }
 0xe38   :  { %v1658_v9 = vpop.permute.xlu0 %1657 }
 0xe39   :  { %4180 = vpow2.f32 %v2409_v7  ;;  %3962 = vmatpush3.msra.mxu0 %v1658_v9 }
 0xe3a   :  { %3964 = vmatmul.mubr.msk.f32.vlgmr.msra.gmra.mrb[20].mxu0 %vm492_vm3, %v1655_v8  ;;  %3971 = vmatprep.subr.bf16.mxu0 %v4313_v15 }
 0xe3b   :  { %3973 = vmatprep.mubr.msk.bf16.mxu0 %vm4314_vm1, %v4313_v15  ;;  %3972 = vmatpush3.bf16.msra.mxu0 %v1816_v24 }
 0xe3c   :  { %3987 = vmatprep.subr.mxu0 %v4313_v15  ;;  %v2628_v26 = vpop.permute.xlu0 %2627 }
 0xe40   :  { %v2706_v29 = vpop.permute.xlu0 %2705 }
 0xe43   :  { %v4181_v10 = vpop.eup %4180 }
 0xe44   :  { %v2414_v11 = vsel %vm492_vm3, %v4181_v10, 0.0  ;;  %v2704_v31 = vpop.permute.xlu0 %2703 }
 0xe45   :  { %2415 = vadd.xlane.f32.xlu1 %v2414_v11 }
 0xe56   :  { %2625 = vrot.lane.b32.xlu1 %v4514_v43, %s4320_s26 }
 0xe77   :  { %v1470_v12 = vpop.f32.mrb[16].mxu0 }
 0xe78   :  { %v4783_v14 = vadd.f32 %v1470_v12, %v4729_v27  ;;  %v3949_v18 = vpop.f32.mrb[17].mxu0 }
 0xe79   :  { %v1473_v20 = vpop.f32.mrb[18].mxu0 }
 0xe7a   :  { %v4788_v21 = vadd.f32 %v1473_v20, %v4731_v30  ;;  %v3950_v22 = vpop.f32.mrb[19].mxu0  ;;  %2018 = vmax.xlane.f32.xlu1 %v2017_v37 }
 0xe7e   :  { %2400 = vmax.xlane.f32.xlu1 %v2399_v23 }
 0xed2   :  { %v2416_v25 = vpop.xlane.xlu1 %2415 }
 0xed3   :  { %4182 = vrcp.f32 %v2416_v25 }
 0xed6   :  { %v2626_v30 = vpop.permute.xlu1 %2625 }
 0xedd   :  { %v4183_v27 = vpop.eup %4182 }
 0xede   :  { %v2420_v28 = vmul.f32 %v4183_v27, %v4181_v10 }
 0xee0   :  { %4021 = vmatmul.mubr.msk.f32.vlgmr.msra.gmra.mrb[44].mxu1 %vm492_vm3, %v2420_v28 }
 0xee1   :  { %4030 = vmatpush3.xpose.msk.msra.mxu1 %vm339_vm2, %v2628_v26  ;;  %4031 = vmatprep.mubr.msk.f32.mxu1 %vm4314_vm1, %v4313_v15  ;;  %v3714_v26 = vld [vmem:[%s5015_s9 + $0xa] sm:$0x3] }
 0xee2   :  { %4034 = vmatprep.subr.mxu1 %v4313_v15  ;;  %v2580_v27 = vsel %vm666_vm4, %v3714_v26, 0 }
 0xee4   :  { %4032 = vmatmul.mubr.msk.f32.vlgmr.msra.gmra.mrb[46].mxu1 %vm339_vm2, %v2626_v30 }
 0xee5   :  { %4035 = vmatpush3.xpose.msk.msra.mxu1 %vm339_vm2, %v2706_v29  ;;  %4036 = vmatprep.mubr.msk.f32.mxu1 %vm4314_vm1, %v4313_v15 }
 0xee6   :  { %4044 = vmatprep.subr.mxu1 %v4313_v15 }
 0xee8   :  { %4037 = vmatmul.mubr.msk.f32.vlgmr.msra.gmra.mrb[48].mxu1 %vm339_vm2, %v2704_v31 }
 0xee9   :  { %4046 = vmatprep.mubr.msk.f32.mxu1 %vm4314_vm1, %v4313_v15 }
 0xf07   :  { %v2019_v32 = vpop.xlane.xlu1 %2018 }
 0xf08   :  { %v2023_v17 = vsub.f32 %v4702_v63, %v2019_v32 }
 0xf0a   :  { %v2025_v33 = vmul.f32 1.442695, %v2023_v17 }
 0xf0b   :  { %v2401_v63 = vpop.xlane.xlu1 %2400 }
 0xf0c   :  { %4184 = vpow2.f32 %v2025_v33 }
 0xf0d   :  { %v1729_v34 = vpop.f32.mrb[20].mxu0 }
 0xf0e   :  { %v1809_v35 = vpack.c.bf16 %v4700_v60, %v1729_v34  ;;  %v3965_v36 = vpop.f32.mrb[21].mxu0  ;;  %v2405_v60 = vsub.f32 %v4760_v55, %v2401_v63 }
 0xf10   :  { %3974 = vmatmul.mubr.msk.bf16.vlgmr.msra.gmra.mrb[24].mxu0 %vm339_vm2, %v1809_v35  ;;  %v2407_v40 = vmul.f32 1.442695, %v2405_v60 }
 0xf11   :  { %3989 = vmatprep.mubr.msk.f32.mxu0 %vm4314_vm1, %v4313_v15 }
 0xf16   :  { %v4185_v0 = vpop.eup %4184 }
 0xf17   :  { %v2029_v1 = vsel %vm492_vm3, %v4185_v0, 0.0 }
 0xf18   :  { %2030 = vadd.xlane.f32.xlu0 %v2029_v1 }
 0xf2e   :  { %2039 = vrot.lane.b32.xlu0 %v4538_v56, %s4318_s25 }
 0xfa5   :  { %v2031_v38 = vpop.xlane.xlu0 %2030 }
 0xfa6   :  { %4186 = vrcp.f32 %v2031_v38 }
 0xfa7   :  { %4188 = vpow2.f32 %v2407_v40  ;;  %v3722_v40 = vld [vmem:[%s5015_s9 + $0xc] sm:$0x3] }
 0xfa9   :  { %v2040_v19 = vpop.permute.xlu0 %2039 }
 0xfaa   :  { %3988 = vmatpush3.msra.mxu0 %v2040_v19 }
 0xfab   :  { %3997 = vmatprep.subr.bf16.mxu0 %v4313_v15 }
 0xfb0   :  { %v4187_v41 = vpop.eup %4186 }
 0xfb1   :  { %v2037_v42 = vmul.f32 %v4187_v41, %v4185_v0  ;;  %v4189_v54 = vpop.eup %4188  ;;  %v2962_v41 = vsel %vm666_vm4, %v3722_v40, 0 }
 0xfb2   :  { %v2411_v55 = vsel %vm492_vm3, %v4189_v54, 0.0 }
 0xfb3   :  { %3990 = vmatmul.mubr.msk.f32.vlgmr.msra.gmra.mrb[22].mxu0 %vm492_vm3, %v2037_v42  ;;  %v4821_v44 = vpop.f32.mrb[44].mxu1 }
 0xfb4   :  { %v4022_v45 = vpop.f32.mrb[45].mxu1  ;;  %3999 = vmatprep.mubr.msk.bf16.mxu0 %vm4314_vm1, %v4313_v15 }
 0xfb7   :  { %v2699_v46 = vpop.f32.mrb[46].mxu1 }
 0xfb8   :  { %v4033_v48 = vpop.f32.mrb[47].mxu1 }
 0xfbb   :  { %v2777_v49 = vpop.f32.mrb[48].mxu1 }
 0xfbc   :  { %v4038_v50 = vpop.f32.mrb[49].mxu1  ;;  %v2784_v52 = vsel %vm492_vm3, %v2777_v49, -inf }
 0xfbd   :  { %2785 = vmax.xlane.f32.xlu1 %v2784_v52 }
 0xfc1   :  { %2412 = vadd.xlane.f32.xlu1 %v2411_v55 }
 0xfd2   :  { %2421 = vrot.lane.b32.xlu1 %v4538_v56, %s4319_s21 }
 0xfd6   :  { %2879 = vrot.lane.b32.xlu1 %v4542_v59, %s4320_s26 }
 0xfda   :  { %3009 = vrot.lane.b32.xlu1 %v4518_v47, %s4321_s0 }
 0xfde   :  { %3007 = vrot.lane.b32.xlu1 %v4514_v43, %s4321_s0  ;;  %v3706_v43 = vld [vmem:[%s5015_s9 + $0x8] sm:$0x3] }
 0xfdf   :  { %v2198_v47 = vsel %vm666_vm4, %v3706_v43, 0 }
 0xfe0   :  { %3998 = vmatpush3.bf16.msra.mxu0 %v2198_v47 }
 0xfe1   :  { %4013 = vmatprep.subr.mxu0 %v4313_v15 }
 0xfe2   :  { %3087 = vrot.lane.b32.xlu1 %v4520_v51, %s4321_s0  ;;  %v2781_v51 = vsel %vm492_vm3, %v2699_v46, -inf }
 0xfe3   :  { %v1852_v57 = vpop.f32.mrb[24].mxu0 }
 0xfe4   :  { %v4838_v58 = vadd.f32 %v1852_v57, %v4783_v14  ;;  %v3975_v62 = vpop.f32.mrb[25].mxu0 }
 0xfe5   :  { %v1855_v2 = vpop.f32.mrb[26].mxu0 }
 0xfe6   :  { %v4841_v3 = vadd.f32 %v1855_v2, %v4788_v21  ;;  %v3976_v4 = vpop.f32.mrb[27].mxu0  ;;  %3085 = vrot.lane.b32.xlu1 %v4529_v53, %s4321_s0 }
0x100a   :  { %2782 = vmax.xlane.f32.xlu1 %v2781_v51 }
0x104a   :  { %v2786_v13 = vpop.xlane.xlu1 %2785 }
0x104b   :  { %v2788_v61 = vsub.f32 %v2777_v49, %v2786_v13 }
0x104d   :  { %v2791_v5 = vmul.f32 1.442695, %v2788_v61 }
0x104e   :  { %v2413_v6 = vpop.xlane.xlu1 %2412 }
0x104f   :  { %4190 = vpow2.f32 %v2791_v5 }
0x1050   :  { %4192 = vrcp.f32 %v2413_v6 }
0x1052   :  { %v2422_v7 = vpop.permute.xlu1 %2421 }
0x1056   :  { %v2880_v8 = vpop.permute.xlu1 %2879 }
0x1057   :  { %4045 = vmatpush3.msra.mxu1 %v2880_v8 }
0x1058   :  { %4055 = vmatprep.subr.mxu1 %v4313_v15 }
0x1059   :  { %v4191_v53 = vpop.eup %4190 }
0x105a   :  { %v2796_v9 = vsel %vm492_vm3, %v4191_v53, 0.0  ;;  %v3010_v10 = vpop.permute.xlu1 %3009  ;;  %v4193_v20 = vpop.eup %4192 }
0x105b   :  { %2797 = vadd.xlane.f32.xlu0 %v2796_v9  ;;  %v2419_v21 = vmul.f32 %v4193_v20, %v4189_v54 }
0x105e   :  { %v3008_v12 = vpop.permute.xlu1 %3007 }
0x1062   :  { %v3088_v37 = vpop.permute.xlu1 %3087 }
0x1066   :  { %v3086_v22 = vpop.permute.xlu1 %3085 }
0x1086   :  { %v2111_v11 = vpop.f32.mrb[22].mxu0 }
0x1087   :  { %v2191_v14 = vpack.c.bf16 %v4758_v16, %v2111_v11  ;;  %v3991_v18 = vpop.f32.mrb[23].mxu0 }
0x1089   :  { %4000 = vmatmul.mubr.msk.bf16.vlgmr.msra.gmra.mrb[28].mxu0 %vm339_vm2, %v2191_v14 }
0x108a   :  { %4014 = vmatpush3.msra.mxu0 %v2422_v7  ;;  %4015 = vmatprep.mubr.msk.f32.mxu0 %vm4314_vm1, %v4313_v15 }
0x108b   :  { %4023 = vmatprep.subr.bf16.mxu0 %v4313_v15 }
0x1091   :  { %4016 = vmatmul.mubr.msk.f32.vlgmr.msra.gmra.mrb[32].mxu0 %vm492_vm3, %v2419_v21 }
0x1092   :  { %4025 = vmatprep.mubr.msk.bf16.mxu0 %vm4314_vm1, %v4313_v15  ;;  %4024 = vmatpush3.bf16.msra.mxu0 %v2580_v27 }
0x1093   :  { %4039 = vmatprep.subr.mxu0 %v4313_v15 }
0x1097   :  { %v2783_v23 = vpop.xlane.xlu1 %2782 }
0x1098   :  { %v2787_v16 = vsub.f32 %v2699_v46, %v2783_v23 }
0x109a   :  { %v2789_v39 = vmul.f32 1.442695, %v2787_v16 }
0x109c   :  { %4194 = vpow2.f32 %v2789_v39 }
0x10a6   :  { %v4195_v24 = vpop.eup %4194 }
0x10a7   :  { %v2793_v25 = vsel %vm492_vm3, %v4195_v24, 0.0 }
0x10a8   :  { %2794 = vadd.xlane.f32.xlu0 %v2793_v25 }
0x10be   :  { %2803 = vrot.lane.b32.xlu0 %v4538_v56, %s4320_s26 }
0x10e8   :  { %v2798_v28 = vpop.xlane.xlu0 %2797 }
0x10e9   :  { %4196 = vrcp.f32 %v2798_v28 }
0x10f3   :  { %v4197_v29 = vpop.eup %4196 }
0x10f4   :  { %v2802_v30 = vmul.f32 %v4197_v29, %v4191_v53 }
0x10f6   :  { %4047 = vmatmul.mubr.msk.f32.vlgmr.msra.gmra.mrb[50].mxu1 %vm492_vm3, %v2802_v30 }
0x10f7   :  { %4056 = vmatpush3.xpose.msk.msra.mxu1 %vm339_vm2, %v3010_v10  ;;  %4057 = vmatprep.mubr.msk.f32.mxu1 %vm4314_vm1, %v4313_v15 }
0x10f8   :  { %4060 = vmatprep.subr.mxu1 %v4313_v15 }
0x10fa   :  { %4058 = vmatmul.mubr.msk.f32.vlgmr.msra.gmra.mrb[52].mxu1 %vm339_vm2, %v3008_v12 }
0x10fb   :  { %4061 = vmatpush3.xpose.msk.msra.mxu1 %vm339_vm2, %v3088_v37  ;;  %4062 = vmatprep.mubr.msk.f32.mxu1 %vm4314_vm1, %v4313_v15 }
0x10fc   :  { %4070 = vmatprep.subr.mxu1 %v4313_v15 }
0x10fe   :  { %4063 = vmatmul.mubr.msk.f32.vlgmr.msra.gmra.mrb[54].mxu1 %vm339_vm2, %v3086_v22 }
0x10ff   :  { %4072 = vmatprep.mubr.msk.f32.mxu1 %vm4314_vm1, %v4313_v15 }
0x1135   :  { %v2795_v32 = vpop.xlane.xlu0 %2794 }
0x1136   :  { %4198 = vrcp.f32 %v2795_v32  ;;  %v3732_v32 = vld [vmem:[%s5016_s10] ss:$0 sm:$0xff] }
0x1139   :  { %v2804_v63 = vpop.permute.xlu0 %2803 }
0x1140   :  { %v4199_v19 = vpop.eup %4198 }
0x1141   :  { %v2801_v60 = vmul.f32 %v4199_v19, %v4195_v24  ;;  %v3730_v24 = vld [vmem:[%s5015_s9 + $0xe] sm:$0x3]  ;;  %s3642_s9 = sshll.u32 %s4322_s7, 4  ;;  %s3643_s9 = int_to_ptr.vmem [resolvable:$true] %s3642_s9 }
0x1142   :  { %v3344_v25 = vsel %vm666_vm4, %v3730_v24, 0  ;;  %s4282_s10 = scalar_lea.vmem %s3643_s9, 256  ;;  %p4287_p11 = scmp.lt.s32.totalorder %s3643_s9, %s3643_s9 }
0x1143   :  { %p4283_p10 = scmp.ne.s32.totalorder %s3643_s9, %s4282_s10  ;;  %p4288_p12 = scmp.lt.s32.totalorder %s4282_s10, %s4282_s10 }
0x1145   :  { %p4289_p13 = por %p4288_p12, %p4287_p11 }
0x1147   :  { %p4290_p0 = pnand %p4289_p13, %p4283_p10 }
0x115c   :  { %v2234_v31 = vpop.f32.mrb[28].mxu0 }
0x115d   :  { %v2241_v17 = vadd.f32 %v2234_v31, %v4838_v58  ;;  %v4001_v33 = vpop.f32.mrb[29].mxu0 }
0x115e   :  { %v2237_v34 = vpop.f32.mrb[30].mxu0 }
0x115f   :  { %v2242_v35 = vadd.f32 %v2237_v34, %v4841_v3  ;;  %v4002_v36 = vpop.f32.mrb[31].mxu0 }
0x1164   :  { %v2493_v0 = vpop.f32.mrb[32].mxu0 }
0x1165   :  { %v2573_v1 = vpack.c.bf16 %v4821_v44, %v2493_v0  ;;  %v4017_v38 = vpop.f32.mrb[33].mxu0 }
0x1167   :  { %4026 = vmatmul.mubr.msk.bf16.vlgmr.msra.gmra.mrb[36].mxu0 %vm339_vm2, %v2573_v1 }
0x1168   :  { %4040 = vmatpush3.msra.mxu0 %v2804_v63  ;;  %4041 = vmatprep.mubr.msk.f32.mxu0 %vm4314_vm1, %v4313_v15 }
0x1169   :  { %4049 = vmatprep.subr.bf16.mxu0 %v4313_v15 }
0x116f   :  { %4042 = vmatmul.mubr.msk.f32.vlgmr.msra.gmra.mrb[34].mxu0 %vm492_vm3, %v2801_v60 }
0x1170   :  { %4051 = vmatprep.mubr.msk.bf16.mxu0 %vm4314_vm1, %v4313_v15  ;;  %4050 = vmatpush3.bf16.msra.mxu0 %v2962_v41 }
0x1171   :  { %4065 = vmatprep.subr.mxu0 %v4313_v15 }
0x11c9   :  { %v2951_v42 = vpop.f32.mrb[50].mxu1 }
0x11ca   :  { %v4048_v44 = vpop.f32.mrb[51].mxu1 }
0x11cd   :  { %v3081_v45 = vpop.f32.mrb[52].mxu1 }
0x11ce   :  { %v4059_v46 = vpop.f32.mrb[53].mxu1  ;;  %v3163_v48 = vsel %vm492_vm3, %v3081_v45, -inf }
0x11cf   :  { %3164 = vmax.xlane.f32.xlu0 %v3163_v48 }
0x11d1   :  { %v3159_v49 = vpop.f32.mrb[54].mxu1 }
0x11d2   :  { %v4064_v50 = vpop.f32.mrb[55].mxu1  ;;  %v3166_v52 = vsel %vm492_vm3, %v3159_v49, -inf }
0x11d3   :  { %3167 = vmax.xlane.f32.xlu1 %v3166_v52  ;;  %v4130_v50 = vld [vmem:[%s5019_s13] sm:$0xff]   ;;  %v4131_v52 = vld [vmem:[%s5019_s13 + $0x8] sm:$0xff]  }
0x11e5   :  { %3261 = vrot.lane.b32.xlu0 %v4542_v59, %s4321_s0 }
0x123a   :  { %v2616_v54 = vpop.f32.mrb[36].mxu0 }
0x123b   :  { %v2623_v55 = vadd.f32 %v2616_v54, %v2241_v17  ;;  %v4027_v57 = vpop.f32.mrb[37].mxu0  ;;  %v4132_v54 = vld [vmem:[%s5021_s15] sm:$0xff]  }
0x123c   :  { %v2619_v58 = vpop.f32.mrb[38].mxu0 }
0x123d   :  { %v2624_v62 = vadd.f32 %v2619_v58, %v2242_v35  ;;  %v4028_v2 = vpop.f32.mrb[39].mxu0 }
0x1242   :  { %v2875_v3 = vpop.f32.mrb[34].mxu0 }
0x1243   :  { %v2955_v4 = vpack.c.bf16 %v2951_v42, %v2875_v3  ;;  %v4043_v43 = vpop.f32.mrb[35].mxu0 }
0x1245   :  { %4052 = vmatmul.mubr.msk.bf16.vlgmr.msra.gmra.mrb[40].mxu0 %vm339_vm2, %v2955_v4 }
0x1246   :  { %4067 = vmatprep.mubr.msk.f32.mxu0 %vm4314_vm1, %v4313_v15 }
0x125c   :  { %v3165_v47 = vpop.xlane.xlu0 %3164 }
0x125d   :  { %v3169_v51 = vsub.f32 %v3081_v45, %v3165_v47 }
0x125f   :  { %v3171_v13 = vmul.f32 1.442695, %v3169_v51  ;;  %v3733_v51 = vld [vmem:[%s5017_s11] ss:$0 sm:$0xff] }
0x1260   :  { %v3262_v61 = vpop.permute.xlu0 %3261  ;;  %v3168_v5 = vpop.xlane.xlu1 %3167 }
0x1261   :  { %4200 = vpow2.f32 %v3171_v13  ;;  %v3170_v59 = vsub.f32 %v3159_v49, %v3168_v5  ;;  %4071 = vmatpush3.msra.mxu1 %v3262_v61 }
0x1262   :  { %4081 = vmatprep.subr.bf16.mxu1 %v4313_v15 }
0x1263   :  { %v3173_v6 = vmul.f32 1.442695, %v3170_v59  ;;  %v3734_v59 = vld [vmem:[%s5018_s12] ss:$0 sm:$0xff] }
0x1265   :  { %4202 = vpow2.f32 %v3173_v6 }
0x126b   :  { %v4201_v7 = vpop.eup %4200 }
0x126c   :  { %v3175_v8 = vsel %vm492_vm3, %v4201_v7, 0.0 }
0x126d   :  { %3176 = vadd.xlane.f32.xlu1 %v3175_v8 }
0x126f   :  { %v4203_v53 = vpop.eup %4202 }
0x1270   :  { %v3178_v9 = vsel %vm492_vm3, %v4203_v53, 0.0 }
0x1271   :  { %3179 = vadd.xlane.f32.xlu1 %v3178_v9  ;;  %v4134_v9 = vld [vmem:[%s5021_s15 + $0x10] sm:$0xff]  }
0x1282   :  { %3185 = vrot.lane.b32.xlu1 %v4538_v56, %s4321_s0 }
0x12fa   :  { %v3177_v10 = vpop.xlane.xlu1 %3176 }
0x12fb   :  { %4204 = vrcp.f32 %v3177_v10  ;;  %v4135_v10 = vld [vmem:[%s5021_s15 + $0x18] sm:$0xff]  }
0x12fe   :  { %v3180_v11 = vpop.xlane.xlu1 %3179 }
0x12ff   :  { %4206 = vrcp.f32 %v3180_v11  ;;  %v4136_v11 = vld [vmem:[%s5021_s15 + $0x20] sm:$0xff]  }
0x1302   :  { %v3186_v12 = vpop.permute.xlu1 %3185 }
0x1303   :  { %4066 = vmatpush3.msra.mxu0 %v3186_v12  ;;  %v4137_v12 = vld [vmem:[%s5021_s15 + $0x28] sm:$0xff]  }
0x1304   :  { %4075 = vmatprep.subr.bf16.mxu0 %v4313_v15 }
0x1305   :  { %v4205_v14 = vpop.eup %4204 }
0x1306   :  { %v3183_v18 = vmul.f32 %v4205_v14, %v4201_v7  ;;  %v4138_v14 = vld [vmem:[%s5021_s15 + $0x30] sm:$0xff]  }
0x1308   :  { %4068 = vmatmul.mubr.msk.f32.vlgmr.msra.gmra.mrb[44].mxu0 %vm492_vm3, %v3183_v18  ;;  %v4139_v18 = vld [vmem:[%s5021_s15 + $0x38] sm:$0xff]  }
0x1309   :  { %v4207_v20 = vpop.eup %4206  ;;  %4077 = vmatprep.mubr.msk.bf16.mxu0 %vm4314_vm1, %v4313_v15  ;;  %4076 = vmatpush3.bf16.msra.mxu0 %v3344_v25 }
0x130a   :  { %v3184_v37 = vmul.f32 %v4207_v20, %v4203_v53  ;;  %4089 = vmatprep.subr.bf16.mxu0 %v4313_v15  ;;  %v3735_v20 = vld [vmem:[%s5020_s14] ss:$0 sm:$0xff] }
0x130c   :  { %4073 = vmatmul.mubr.msk.f32.vlgmr.msra.gmra.mrb[56].mxu1 %vm492_vm3, %v3184_v37 }
0x130d   :  { %4085 = vmatprep.mubr.msk.bf16.mxu1 %vm4314_vm1, %v4313_v15  ;;  %4082 = vmatpush3.bf16.msra.mxu1 %v4130_v50 }
0x130e   :  { %4083 = vmatprep.subr.bf16.mxu1 %v4313_v15 }
0x1311   :  { %4084 = vmatpush3.bf16.msra.mxu1 %v4131_v52 }
0x1318   :  { %v2998_v56 = vpop.f32.mrb[40].mxu0 }
0x1319   :  { %v3005_v21 = vadd.f32 %v2998_v56, %v2623_v55  ;;  %v4053_v22 = vpop.f32.mrb[41].mxu0  ;;  %v4133_v55 = vld [vmem:[%s5021_s15 + $0x8] sm:$0xff]  }
0x131a   :  { %v3001_v23 = vpop.f32.mrb[42].mxu0 }
0x131b   :  { %v3006_v16 = vadd.f32 %v3001_v23, %v2624_v62  ;;  %v4054_v39 = vpop.f32.mrb[43].mxu0 }
0x13db   :  { %v3257_v26 = vpop.f32.mrb[44].mxu0 }
0x13dc   :  { %v4069_v27 = vpop.f32.mrb[45].mxu0 }
0x13df   :  { %v3333_v28 = vpop.f32.mrb[56].mxu1 }
0x13e0   :  { %v3337_v29 = vpack.c.bf16 %v3333_v28, %v3257_v26  ;;  %v4074_v30 = vpop.f32.mrb[57].mxu1 }
0x13e2   :  { %4078 = vmatmul.mubr.msk.bf16.vlgmr.msra.gmra.mrb[48].mxu0 %vm339_vm2, %v3337_v29 }
0x13e3   :  { %4105 = vmatprep.mubr.msk.bf16.mxu0 %vm4314_vm1, %v4313_v15  ;;  %4090 = vmatpush3.bf16.msra.mxu0 %v4132_v54 }
0x13e4   :  { %4091 = vmatprep.subr.bf16.mxu0 %v4313_v15 }
0x13e7   :  { %4092 = vmatpush3.bf16.msra.mxu0 %v4133_v55 }
0x13e8   :  { %4093 = vmatprep.subr.bf16.mxu0 %v4313_v15 }
0x13eb   :  { %4094 = vmatpush3.bf16.msra.mxu0 %v4134_v9 }
0x13ec   :  { %4095 = vmatprep.subr.bf16.mxu0 %v4313_v15 }
0x13ef   :  { %4096 = vmatpush3.bf16.msra.mxu0 %v4135_v10 }
0x13f0   :  { %4097 = vmatprep.subr.bf16.mxu0 %v4313_v15 }
0x13f3   :  { %4098 = vmatpush3.bf16.msra.mxu0 %v4136_v11 }
0x13f4   :  { %4099 = vmatprep.subr.bf16.mxu0 %v4313_v15 }
0x13f7   :  { %4100 = vmatpush3.bf16.msra.mxu0 %v4137_v12 }
0x13f8   :  { %4101 = vmatprep.subr.bf16.mxu0 %v4313_v15 }
0x13fb   :  { %4102 = vmatpush3.bf16.msra.mxu0 %v4138_v14 }
0x13fc   :  { %4103 = vmatprep.subr.bf16.mxu0 %v4313_v15 }
0x13ff   :  { %4104 = vmatpush3.bf16.msra.mxu0 %v4139_v18 }
0x14b5   :  { %v3380_v31 = vpop.f32.mrb[48].mxu0 }
0x14b6   :  { %v3387_v17 = vadd.f32 %v3380_v31, %v3005_v21  ;;  %v4079_v33 = vpop.f32.mrb[49].mxu0 }
0x14b7   :  { %v3383_v34 = vpop.f32.mrb[50].mxu0 }
0x14b8   :  { %v4927_v35 = vadd.f32 %v3732_v32, %v3387_v17  ;;  %v3388_v36 = vadd.f32 %v3383_v34, %v3006_v16  ;;  %v4080_v0 = vpop.f32.mrb[51].mxu0  ;;  %v3739_v17 = vld [vmem:[%s5022_s16] ss:$0 sm:$0xff] }
0x14ba   :  { %v4929_v1 = vadd.f32 %v3732_v32, %v3388_v36  ;;  %v3400_v38 = vsel %vm97_vm0, %v4927_v35, 0.0 }
0x14bb   :  { %3401 = vadd.xlane.f32.xlu1 %v3400_v38 }
0x14bc   :  { %v3403_v63 = vsel %vm97_vm0, %v4929_v1, 0.0 }
0x14bd   :  { %3404 = vadd.xlane.f32.xlu0 %v3403_v63 }
0x1548   :  { %v3402_v19 = vpop.xlane.xlu1 %3401 }
0x1549   :  { %v3406_v60 = vmul.f32 0.03125, %v3402_v19 }
0x154a   :  { %v3405_v40 = vpop.xlane.xlu0 %3404 }
0x154b   :  { %v3408_v41 = vsub.f32 %v4927_v35, %v3406_v60  ;;  %v3407_v42 = vmul.f32 0.03125, %v3405_v40 }
0x154d   :  { %v3409_v44 = vsub.f32 %v4929_v1, %v3407_v42  ;;  %v3410_v45 = vmul.f32 %v3408_v41, %v3408_v41 }
0x154f   :  { %v3412_v46 = vsel %vm97_vm0, %v3410_v45, 0.0  ;;  %v3411_v48 = vmul.f32 %v3409_v44, %v3409_v44 }
0x1550   :  { %3413 = vadd.xlane.f32.xlu1 %v3412_v46 }
0x1551   :  { %v3415_v49 = vsel %vm97_vm0, %v3411_v48, 0.0 }
0x1554   :  { %3416 = vadd.xlane.f32.xlu1 %v3415_v49 }
0x15dd   :  { %v3414_v57 = vpop.xlane.xlu1 %3413 }
0x15de   :  { %v3418_v58 = vmul.f32 0.03125, %v3414_v57 }
0x15e0   :  { %v3420_v62 = vadd.f32 1e-05, %v3418_v58 }
0x15e1   :  { %v3417_v2 = vpop.xlane.xlu1 %3416 }
0x15e2   :  { %4208 = vrsqrt.f32 %v3420_v62  ;;  %v3419_v3 = vmul.f32 0.03125, %v3417_v2 }
0x15e4   :  { %v3421_v4 = vadd.f32 1e-05, %v3419_v3 }
0x15e6   :  { %4210 = vrsqrt.f32 %v3421_v4 }
0x15ec   :  { %v4209_v43 = vpop.eup %4208 }
0x15ed   :  { %v3424_v47 = vmul.f32 %v4209_v43, %v3408_v41 }
0x15ef   :  { %v3432_v61 = vmul.f32 %v3733_v51, %v3424_v47 }
0x15f0   :  { %v4211_v13 = vpop.eup %4210 }
0x15f1   :  { %v3425_v5 = vmul.f32 %v4211_v13, %v3409_v44  ;;  %v3440_v7 = vadd.f32 %v3734_v59, %v3432_v61 }
0x15f3   :  { %v3433_v6 = vmul.f32 %v3733_v51, %v3425_v5 }
0x15f5   :  { %v3441_v8 = vadd.f32 %v3734_v59, %v3433_v6 }
0x15f7   :  { %v3442_v53 = vpack.c.bf16 %v3441_v8, %v3440_v7 }
0x15f9   :  { %4086 = vmatmul.mubr.msk.bf16.vlgmr.msra.gmra.mrb[60].mxu1 %vm97_vm0, %v3442_v53 }
0x16cc   :  { %v3503_v37 = vpop.f32.mrb[60].mxu1 }
0x16cd   :  { %v3504_v56 = vadd.f32 %v3735_v20, %v3503_v37  ;;  %v4087_v21 = vpop.f32.mrb[61].mxu1 }
0x16ce   :  { %v3506_v22 = vpop.f32.mrb[62].mxu1 }
0x16cf   :  { %v3512_v23 = vmul.f32 0.70710677, %v3504_v56  ;;  %v3507_v16 = vadd.f32 %v3735_v20, %v3506_v22  ;;  %v4088_v39 = vpop.f32.mrb[63].mxu1  ;;  %v3510_v27 = vmul.f32 0.5, %v3504_v56 }
0x16d1   :  { %4212 = verf.f32 %v3512_v23  ;;  %v3513_v24 = vmul.f32 0.70710677, %v3507_v16  ;;  %v3511_v28 = vmul.f32 0.5, %v3507_v16 }
0x16d3   :  { %4214 = verf.f32 %v3513_v24 }
0x16db   :  { %v4213_v15 = vpop.eup %4212 }
0x16dc   :  { %v3516_v25 = vadd.f32 1.0, %v4213_v15 }
0x16dd   :  { %v4215_v26 = vpop.eup %4214 }
0x16de   :  { %v3517_v29 = vadd.f32 1.0, %v4215_v26  ;;  %v3518_v30 = vmul.f32 %v3516_v25, %v3510_v27 }
0x16e0   :  { %v3519_v31 = vmul.f32 %v3517_v29, %v3511_v28 }
0x16e2   :  { %v3520_v32 = vpack.c.bf16 %v3519_v31, %v3518_v30 }
0x16e4   :  { %4106 = vmatmul.mubr.bf16.vlgmr.msra.gmra.mrb[52].mxu0 %v3520_v32 }
0x17b7   :  { %v3626_v33 = vpop.f32.mrb[52].mxu0 }
0x17b8   :  { %v3627_v34 = vadd.f32 %v3739_v17, %v3626_v33  ;;  %v4107_v36 = vpop.f32.mrb[53].mxu0 }
0x17b9   :  { %v3629_v0 = vpop.f32.mrb[54].mxu0 }
0x17ba   :  { %v3633_v38 = vadd.f32 %v3627_v34, %v4927_v35  ;;  %v3630_v63 = vadd.f32 %v3739_v17, %v3629_v0  ;;  %v4108_v19 = vpop.f32.mrb[55].mxu0 }
0x17bc   :  { %3635 = vst.msk [vmem:[#allocation8] sm:$0xff] %vm97_vm0, %v3633_v38  ;;  %v3634_v60 = vadd.f32 %v3630_v63, %v4929_v1 }
0x17be   :  { %3636 = vst.msk [vmem:[#allocation8 + $0x8] sm:$0xff] %vm97_vm0, %v3634_v60 }
0x17bf   :  { %4293 = shalt.err (!%p4290_p0)
}
0x17c0   :  { %s4294_s20 = scalar_lea.hbm %s5023_s17, 256 }
0x17c1   :  { %p4295_p1 = scmp.ne.s32.totalorder %s5023_s17, %s4294_s20  ;;  %p4298_p2 = scmp.lt.u32.totalorder %s4294_s20, %s5023_s17 }
0x17c3   :  { %p4300_p3 = pnand %p4298_p2, %p4295_p1 }
0x17c5   :  { %4303 = shalt.err (!%p4300_p3)
}
0x17c6   :  { %s4323_s13 = smov 128   ;;  %s4324_s3 = smov 8  }
0x17c7   :  { %3648 = dma.vmem_to_hbm [thread:$0]  %s3643_s9, 256, %s5023_s17, [#allocation4], %s4323_s13, %s4323_s13, %s4324_s3  }
0x17c8   :  { %4308 = dma.done.wait [#allocation4], 256  }
0x17c9   :  { %4309 = vsyncadd [#allocation4], 4294967040 }
0x17ca   :  { %3652 = vsyncpa [#allocation3], 1 }
0x17cb   :  { %3653 = vsyncpa [#allocation6], 1 }
0x17cc   :  { %3654 = vsyncpa [#allocation4], 1 }

</bundles_post_ra>
